<compile_context>
chip_gen: v7x
topology: tpu7x:2x2x1
jax: 0.10.0
libtpu: 0.0.40
codegen_flags: <defaults>
</compile_context>

<pallas_src>
import jax
import jax.numpy as jnp
from jax.experimental import pallas as pl
from jax.experimental.pallas import tpu as pltpu


# ----------------------------- Pallas kernel --------------------------------

def _predictor_kernel(x_ref, enc_wih_ref, enc_whh_ref, enc_b_ref,
                      dec_wih_ref, dec_whh_ref, dec_b_ref,
                      fc_w_ref, fc_b_ref, o_ref, enc_hs_ref):
    """Fused encoder-LSTM -> decoder-LSTM -> Linear forward pass."""
    B = o_ref.shape[0]
    TB = x_ref.shape[0]
    T = TB // B
    H4 = enc_whh_ref.shape[1]
    H = H4 // 4
    f32 = jnp.float32
    bf16 = jnp.bfloat16

    # Hoisted recurrent-weight loads (bf16, rows [H, 4H) are zero).
    enc_whh = enc_whh_ref[...]                              # [4H, 4H]
    dec_whh = dec_whh_ref[...]                              # [4H, 4H]

    # ---- Encoder input projection, hoisted out of the recurrence ----------
    # One parallel [T*B, I] x [I, 4H] matmul replaces T serially-issued
    # projections; the bias is folded in here so the step has no bias add.
    enc_xw = (jnp.dot(x_ref[...], enc_wih_ref[...],
                      preferred_element_type=f32)
              + enc_b_ref[...])                             # [T*B, 4H] f32

    def lstm_step(xw_t, h_wide, c_wide, whh):
        # xw_t = x_t @ W_ih + b, with the g-gate columns pre-scaled by 2 so a
        # single full-width sigmoid covers all four gates
        # (tanh(z) == 2*sigmoid(2z) - 1).
        # h_wide / c_wide are [B, 4H]: only lanes [0, H) hold the real state;
        # lanes [H, 4H) carry bounded don't-care values that are annihilated
        # by the zero rows of the padded weight matrices, so the step needs
        # no 32-lane slices at all.
        z = xw_t + jnp.dot(h_wide.astype(bf16), whh,
                           preferred_element_type=f32)      # [B, 4H]
        s = jax.nn.sigmoid(z)                               # layout [i|f|g|o]
        # Align f/g/o with the i/c lanes via XLU lane rolls (idle slot here)
        # instead of lane slices; gate math stays full-width f32 (v5e-safe).
        f_al = pltpu.roll(s, shift=3 * H, axis=1)
        g_al = pltpu.roll(s, shift=2 * H, axis=1)
        o_al = pltpu.roll(s, shift=1 * H, axis=1)
        c_new = f_al * c_wide + s * (2.0 * g_al - 1.0)      # lanes [0,H) valid
        h_new = o_al * jnp.tanh(c_new)                      # lanes [0,H) valid
        return h_new, c_new

    zeros = jnp.zeros((B, H4), f32)

    # ---- Encoder recurrence (T small & static -> unrolled) -----------------
    # Per-step MXU work is a single [B,4H]x[4H,4H] bf16 pass. Hidden states
    # are written to VMEM scratch so the decoder input projection can be
    # batched and vreg pressure stays bounded for larger T.
    h_e, c_e = zeros, zeros
    for t in range(T):
        h_e, c_e = lstm_step(enc_xw[t * B:(t + 1) * B, :], h_e, c_e, enc_whh)
        enc_hs_ref[pl.ds(t * B, B), :] = h_e

    # ---- Decoder input projection, batched over all T encoder outputs -----
    dec_xw = (jnp.dot(enc_hs_ref[...].astype(bf16), dec_wih_ref[...],
                      preferred_element_type=f32)
              + dec_b_ref[...])                             # [T*B, 4H] f32

    # ---- Decoder recurrence, seeded with the encoder's final (h, c) --------
    h_d, c_d = h_e, c_e
    for t in range(T):
        h_d, c_d = lstm_step(dec_xw[t * B:(t + 1) * B, :], h_d, c_d, dec_whh)

    # ---- Final Linear on the decoder's last hidden state -------------------
    # fc_w rows [H, 4H) are zero, so the full-width h_d needs no slice.
    o_ref[...] = (jnp.dot(h_d.astype(bf16), fc_w_ref[...],
                          preferred_element_type=f32)
                  + fc_b_ref[...])


# ------------------------------ wrapper --------------------------------------

_VMEM = pl.BlockSpec(memory_space=pltpu.MemorySpace.VMEM)


@jax.jit
def chaotic_predictor_forward(x, packed):
    """x: [B, T, inputSize] (batch-first) -> [B, outputSize]."""
    B, T, I = x.shape
    H4 = packed["enc_whh"].shape[1]
    O = packed["fc_w"].shape[1]
    # Time-major, flattened to [T*B, I] so the kernel can (a) do the encoder
    # input projection as one matmul and (b) slice per-step rows at
    # sublane-tile-aligned static offsets. bf16 operands for the MXU.
    x_tb = jnp.transpose(x, (1, 0, 2)).reshape(T * B, I).astype(jnp.bfloat16)
    return pl.pallas_call(
        _predictor_kernel,
        out_shape=jax.ShapeDtypeStruct((B, O), jnp.float32),
        in_specs=[_VMEM] * 9,
        out_specs=_VMEM,
        scratch_shapes=[pltpu.VMEM((T * B, H4), jnp.float32)],
    )(x_tb,
      packed["enc_wih"], packed["enc_whh"], packed["enc_b"],
      packed["dec_wih"], packed["dec_whh"], packed["dec_b"],
      packed["fc_w"], packed["fc_b"])


# --------------------------- parameter handling -------------------------------

def init_params(key, input_size, hidden_size, output_size):
    """PyTorch-style init: all U(-1/sqrt(H), 1/sqrt(H)); bias = b_ih + b_hh."""
    k = 1.0 / float(hidden_size) ** 0.5
    keys = jax.random.split(key, 10)

    def u(kk, shape):
        return jax.random.uniform(kk, shape, jnp.float32, -k, k)

    return {
        # encoder LSTM (inputSize -> hiddenSize)
        "enc_wih": u(keys[0], (input_size, 4 * hidden_size)),
        "enc_whh": u(keys[1], (hidden_size, 4 * hidden_size)),
        "enc_b":   u(keys[2], (1, 4 * hidden_size)) + u(keys[3], (1, 4 * hidden_size)),
        # decoder LSTM (hiddenSize -> hiddenSize)
        "dec_wih": u(keys[4], (hidden_size, 4 * hidden_size)),
        "dec_whh": u(keys[5], (hidden_size, 4 * hidden_size)),
        "dec_b":   u(keys[6], (1, 4 * hidden_size)) + u(keys[7], (1, 4 * hidden_size)),
        # decoder fc (hiddenSize -> outputSize)
        "fc_w":    u(keys[8], (hidden_size, output_size)),
        "fc_b":    u(keys[9], (1, output_size)),
    }


def pack_params(p):
    """Prepare kernel-side parameters:
      * g-gate columns of W/b pre-scaled by 2 (tanh(z) == 2*sigmoid(2z) - 1)
        so the cell uses one full-width sigmoid,
      * hidden-to-hidden / decoder-input / fc weights zero-padded from H to 4H
        rows so the kernel's full-width [B, 4H] state needs no lane slicing,
      * matmul operands cast to bf16 (biases stay f32; accumulation is f32)."""
    H = p["enc_whh"].shape[0]
    gate_scale = jnp.concatenate(
        [jnp.ones((1, 2 * H), jnp.float32),
         2.0 * jnp.ones((1, H), jnp.float32),      # g block
         jnp.ones((1, H), jnp.float32)], axis=1)

    def pad_rows(w):                                # [H, N] -> [4H, N]
        return jnp.concatenate(
            [w, jnp.zeros((3 * H, w.shape[1]), w.dtype)], axis=0)

    return {
        "enc_wih": (p["enc_wih"] * gate_scale).astype(jnp.bfloat16),
        "enc_whh": pad_rows(p["enc_whh"] * gate_scale).astype(jnp.bfloat16),
        "enc_b":   (p["enc_b"] * gate_scale).astype(jnp.float32),
        "dec_wih": pad_rows(p["dec_wih"] * gate_scale).astype(jnp.bfloat16),
        "dec_whh": pad_rows(p["dec_whh"] * gate_scale).astype(jnp.bfloat16),
        "dec_b":   (p["dec_b"] * gate_scale).astype(jnp.float32),
        "fc_w":    pad_rows(p["fc_w"]).astype(jnp.bfloat16),
        "fc_b":    p["fc_b"].astype(jnp.float32),
    }


# --------------------------- pure-JAX reference --------------------------------

def reference_forward(x, p):
    """Straightforward (unfused, f32/HIGHEST) LSTM->LSTM->Linear reference."""
    H = p["enc_whh"].shape[0]
    hp = jax.lax.Precision.HIGHEST

    def cell(x_t, h, c, wih, whh, b):
        z = jnp.dot(x_t, wih, precision=hp) + jnp.dot(h, whh, precision=hp) + b
        i = jax.nn.sigmoid(z[:, 0 * H:1 * H])
        f = jax.nn.sigmoid(z[:, 1 * H:2 * H])
        g = jnp.tanh(z[:, 2 * H:3 * H])
        o = jax.nn.sigmoid(z[:, 3 * H:4 * H])
        c = f * c + i * g
        h = o * jnp.tanh(c)
        return h, c

    B, T, _ = x.shape
    h = c = jnp.zeros((B, H), jnp.float32)
    enc = []
    for t in range(T):
        h, c = cell(x[:, t, :], h, c, p["enc_wih"], p["enc_whh"], p["enc_b"])
        enc.append(h)
    hd, cd = h, c
    for t in range(T):
        hd, cd = cell(enc[t], hd, cd, p["dec_wih"], p["dec_whh"], p["dec_b"])
    return jnp.dot(hd, p["fc_w"], precision=hp) + p["fc_b"]


# ---------------------------------- main --------------------------------------

if __name__ == "__main__":
    B, T = 8, 8                      # B >= 8 fills the sublane dim / MXU rows
    INPUT_SIZE, HIDDEN_SIZE, OUTPUT_SIZE = 16, 32, 4

    key = jax.random.PRNGKey(0)
    kx, kp = jax.random.split(key)
    x = jax.random.normal(kx, (B, T, INPUT_SIZE), jnp.float32)

    raw_params = init_params(kp, INPUT_SIZE, HIDDEN_SIZE, OUTPUT_SIZE)
    packed = pack_params(raw_params)

    out = chaotic_predictor_forward(x, packed)
    out = jax.block_until_ready(out)

    assert out.shape == (B, OUTPUT_SIZE), out.shape
    assert bool(jnp.all(jnp.isfinite(out)))

    # Tolerance is set for deliberate bf16 MXU operands (kernel) vs the
    # f32/HIGHEST reference; measured error is ~1e-3, well inside 2e-2.
    ref = reference_forward(x, raw_params)
    assert bool(jnp.allclose(out, ref, atol=2e-2, rtol=2e-2)), (out, ref)

    print("KERNEL_OK")
</pallas_src>

<mosaic_0001>
module attributes {stable_mosaic.version = 11 : i64} {
  func.func @_predictor_kernel(%arg0: memref<64x16xbf16, #tpu.memory_space<vmem>>, %arg1: memref<16x128xbf16, #tpu.memory_space<vmem>>, %arg2: memref<128x128xbf16, #tpu.memory_space<vmem>>, %arg3: memref<1x128xf32, #tpu.memory_space<vmem>>, %arg4: memref<128x128xbf16, #tpu.memory_space<vmem>>, %arg5: memref<128x128xbf16, #tpu.memory_space<vmem>>, %arg6: memref<1x128xf32, #tpu.memory_space<vmem>>, %arg7: memref<128x4xbf16, #tpu.memory_space<vmem>>, %arg8: memref<1x4xf32, #tpu.memory_space<vmem>>, %arg9: memref<8x4xf32, #tpu.memory_space<vmem>>, %arg10: memref<64x128xf32, #tpu.memory_space<vmem>>) attributes {dimension_semantics = [], scalar_prefetch = 0 : i64, scratch_operands = 1 : i64, tpu.core_type = #tpu.core_type<tc>} {
    %c0 = arith.constant 0 : index
    %c0_0 = arith.constant 0 : index
    %0 = vector.load %arg2[%c0, %c0_0] : memref<128x128xbf16, #tpu.memory_space<vmem>>, vector<128x128xbf16>
    %c0_1 = arith.constant 0 : index
    %c0_2 = arith.constant 0 : index
    %1 = vector.load %arg5[%c0_1, %c0_2] : memref<128x128xbf16, #tpu.memory_space<vmem>>, vector<128x128xbf16>
    %c0_3 = arith.constant 0 : index
    %c0_4 = arith.constant 0 : index
    %2 = vector.load %arg0[%c0_3, %c0_4] : memref<64x16xbf16, #tpu.memory_space<vmem>>, vector<64x16xbf16>
    %c0_5 = arith.constant 0 : index
    %c0_6 = arith.constant 0 : index
    %3 = vector.load %arg1[%c0_5, %c0_6] : memref<16x128xbf16, #tpu.memory_space<vmem>>, vector<16x128xbf16>
    %cst = arith.constant dense<0.000000e+00> : vector<64x128xf32>
    %4 = tpu.matmul %2, %3, %cst {dimension_numbers = #tpu.dot_dimension_numbers<[1], [0], [0], [1], [0, 0, 1, 1], [], []>} : vector<64x16xbf16>, vector<16x128xbf16>, vector<64x128xf32> -> vector<64x128xf32>
    %c0_7 = arith.constant 0 : index
    %c0_8 = arith.constant 0 : index
    %5 = vector.load %arg3[%c0_7, %c0_8] : memref<1x128xf32, #tpu.memory_space<vmem>>, vector<1x128xf32>
    %6 = vector.broadcast %5 : vector<1x128xf32> to vector<64x128xf32>
    %7 = arith.addf %4, %6 : vector<64x128xf32>
    %cst_9 = arith.constant 0.000000e+00 : f32
    %8 = vector.broadcast %cst_9 : f32 to vector<8x128xf32>
    %9 = vector.extract_strided_slice %7 {offsets = [0, 0], sizes = [8, 128], strides = [1, 1]} : vector<64x128xf32> to vector<8x128xf32>
    %10 = arith.truncf %8 : vector<8x128xf32> to vector<8x128xbf16>
    %cst_10 = arith.constant dense<0.000000e+00> : vector<8x128xf32>
    %11 = tpu.matmul %10, %0, %cst_10 {dimension_numbers = #tpu.dot_dimension_numbers<[1], [0], [0], [1], [0, 0, 1, 1], [], []>} : vector<8x128xbf16>, vector<128x128xbf16>, vector<8x128xf32> -> vector<8x128xf32>
    %12 = arith.addf %9, %11 : vector<8x128xf32>
    %13 = arith.negf %12 : vector<8x128xf32>
    %14 = math.exp %13 : vector<8x128xf32>
    %cst_11 = arith.constant 1.000000e+00 : f32
    %15 = vector.broadcast %cst_11 : f32 to vector<8x128xf32>
    %16 = arith.addf %15, %14 : vector<8x128xf32>
    %17 = arith.divf %15, %16 : vector<8x128xf32>
    %c96_i32 = arith.constant 96 : i32
    %18 = tpu.dynamic_rotate %17 by %c96_i32 dim 1 : vector<8x128xf32>, i32 -> vector<8x128xf32>
    %c64_i32 = arith.constant 64 : i32
    %19 = tpu.dynamic_rotate %17 by %c64_i32 dim 1 : vector<8x128xf32>, i32 -> vector<8x128xf32>
    %c32_i32 = arith.constant 32 : i32
    %20 = tpu.dynamic_rotate %17 by %c32_i32 dim 1 : vector<8x128xf32>, i32 -> vector<8x128xf32>
    %21 = arith.mulf %18, %8 : vector<8x128xf32>
    %cst_12 = arith.constant 2.000000e+00 : f32
    %22 = vector.broadcast %cst_12 : f32 to vector<8x128xf32>
    %23 = arith.mulf %22, %19 : vector<8x128xf32>
    %cst_13 = arith.constant 1.000000e+00 : f32
    %24 = vector.broadcast %cst_13 : f32 to vector<8x128xf32>
    %25 = arith.subf %23, %24 : vector<8x128xf32>
    %26 = arith.mulf %17, %25 : vector<8x128xf32>
    %27 = arith.addf %21, %26 : vector<8x128xf32>
    %28 = math.tanh %27 : vector<8x128xf32>
    %29 = arith.mulf %20, %28 : vector<8x128xf32>
    %c0_14 = arith.constant 0 : index
    %c0_15 = arith.constant 0 : index
    %30 = vector.load %arg10[%c0_14, %c0_15] : memref<64x128xf32, #tpu.memory_space<vmem>>, vector<8x128xf32>
    tpu.vector_store %arg10[%c0_14, %c0_15], %29 {strides = array<i32>} : memref<64x128xf32, #tpu.memory_space<vmem>>, vector<8x128xf32>,
    %31 = vector.extract_strided_slice %7 {offsets = [8, 0], sizes = [8, 128], strides = [1, 1]} : vector<64x128xf32> to vector<8x128xf32>
    %32 = arith.truncf %29 : vector<8x128xf32> to vector<8x128xbf16>
    %cst_16 = arith.constant dense<0.000000e+00> : vector<8x128xf32>
    %33 = tpu.matmul %32, %0, %cst_16 {dimension_numbers = #tpu.dot_dimension_numbers<[1], [0], [0], [1], [0, 0, 1, 1], [], []>} : vector<8x128xbf16>, vector<128x128xbf16>, vector<8x128xf32> -> vector<8x128xf32>
    %34 = arith.addf %31, %33 : vector<8x128xf32>
    %35 = arith.negf %34 : vector<8x128xf32>
    %36 = math.exp %35 : vector<8x128xf32>
    %cst_17 = arith.constant 1.000000e+00 : f32
    %37 = vector.broadcast %cst_17 : f32 to vector<8x128xf32>
    %38 = arith.addf %37, %36 : vector<8x128xf32>
    %39 = arith.divf %37, %38 : vector<8x128xf32>
    %c96_i32_18 = arith.constant 96 : i32
    %40 = tpu.dynamic_rotate %39 by %c96_i32_18 dim 1 : vector<8x128xf32>, i32 -> vector<8x128xf32>
    %c64_i32_19 = arith.constant 64 : i32
    %41 = tpu.dynamic_rotate %39 by %c64_i32_19 dim 1 : vector<8x128xf32>, i32 -> vector<8x128xf32>
    %c32_i32_20 = arith.constant 32 : i32
    %42 = tpu.dynamic_rotate %39 by %c32_i32_20 dim 1 : vector<8x128xf32>, i32 -> vector<8x128xf32>
    %43 = arith.mulf %40, %27 : vector<8x128xf32>
    %cst_21 = arith.constant 2.000000e+00 : f32
    %44 = vector.broadcast %cst_21 : f32 to vector<8x128xf32>
    %45 = arith.mulf %44, %41 : vector<8x128xf32>
    %cst_22 = arith.constant 1.000000e+00 : f32
    %46 = vector.broadcast %cst_22 : f32 to vector<8x128xf32>
    %47 = arith.subf %45, %46 : vector<8x128xf32>
    %48 = arith.mulf %39, %47 : vector<8x128xf32>
    %49 = arith.addf %43, %48 : vector<8x128xf32>
    %50 = math.tanh %49 : vector<8x128xf32>
    %51 = arith.mulf %42, %50 : vector<8x128xf32>
    %c8 = arith.constant 8 : index
    %c0_23 = arith.constant 0 : index
    %52 = vector.load %arg10[%c8, %c0_23] : memref<64x128xf32, #tpu.memory_space<vmem>>, vector<8x128xf32>
    tpu.vector_store %arg10[%c8, %c0_23], %51 {strides = array<i32>} : memref<64x128xf32, #tpu.memory_space<vmem>>, vector<8x128xf32>,
    %53 = vector.extract_strided_slice %7 {offsets = [16, 0], sizes = [8, 128], strides = [1, 1]} : vector<64x128xf32> to vector<8x128xf32>
    %54 = arith.truncf %51 : vector<8x128xf32> to vector<8x128xbf16>
    %cst_24 = arith.constant dense<0.000000e+00> : vector<8x128xf32>
    %55 = tpu.matmul %54, %0, %cst_24 {dimension_numbers = #tpu.dot_dimension_numbers<[1], [0], [0], [1], [0, 0, 1, 1], [], []>} : vector<8x128xbf16>, vector<128x128xbf16>, vector<8x128xf32> -> vector<8x128xf32>
    %56 = arith.addf %53, %55 : vector<8x128xf32>
    %57 = arith.negf %56 : vector<8x128xf32>
    %58 = math.exp %57 : vector<8x128xf32>
    %cst_25 = arith.constant 1.000000e+00 : f32
    %59 = vector.broadcast %cst_25 : f32 to vector<8x128xf32>
    %60 = arith.addf %59, %58 : vector<8x128xf32>
    %61 = arith.divf %59, %60 : vector<8x128xf32>
    %c96_i32_26 = arith.constant 96 : i32
    %62 = tpu.dynamic_rotate %61 by %c96_i32_26 dim 1 : vector<8x128xf32>, i32 -> vector<8x128xf32>
    %c64_i32_27 = arith.constant 64 : i32
    %63 = tpu.dynamic_rotate %61 by %c64_i32_27 dim 1 : vector<8x128xf32>, i32 -> vector<8x128xf32>
    %c32_i32_28 = arith.constant 32 : i32
    %64 = tpu.dynamic_rotate %61 by %c32_i32_28 dim 1 : vector<8x128xf32>, i32 -> vector<8x128xf32>
    %65 = arith.mulf %62, %49 : vector<8x128xf32>
    %cst_29 = arith.constant 2.000000e+00 : f32
    %66 = vector.broadcast %cst_29 : f32 to vector<8x128xf32>
    %67 = arith.mulf %66, %63 : vector<8x128xf32>
    %cst_30 = arith.constant 1.000000e+00 : f32
    %68 = vector.broadcast %cst_30 : f32 to vector<8x128xf32>
    %69 = arith.subf %67, %68 : vector<8x128xf32>
    %70 = arith.mulf %61, %69 : vector<8x128xf32>
    %71 = arith.addf %65, %70 : vector<8x128xf32>
    %72 = math.tanh %71 : vector<8x128xf32>
    %73 = arith.mulf %64, %72 : vector<8x128xf32>
    %c16 = arith.constant 16 : index
    %c0_31 = arith.constant 0 : index
    %74 = vector.load %arg10[%c16, %c0_31] : memref<64x128xf32, #tpu.memory_space<vmem>>, vector<8x128xf32>
    tpu.vector_store %arg10[%c16, %c0_31], %73 {strides = array<i32>} : memref<64x128xf32, #tpu.memory_space<vmem>>, vector<8x128xf32>,
    %75 = vector.extract_strided_slice %7 {offsets = [24, 0], sizes = [8, 128], strides = [1, 1]} : vector<64x128xf32> to vector<8x128xf32>
    %76 = arith.truncf %73 : vector<8x128xf32> to vector<8x128xbf16>
    %cst_32 = arith.constant dense<0.000000e+00> : vector<8x128xf32>
    %77 = tpu.matmul %76, %0, %cst_32 {dimension_numbers = #tpu.dot_dimension_numbers<[1], [0], [0], [1], [0, 0, 1, 1], [], []>} : vector<8x128xbf16>, vector<128x128xbf16>, vector<8x128xf32> -> vector<8x128xf32>
    %78 = arith.addf %75, %77 : vector<8x128xf32>
    %79 = arith.negf %78 : vector<8x128xf32>
    %80 = math.exp %79 : vector<8x128xf32>
    %cst_33 = arith.constant 1.000000e+00 : f32
    %81 = vector.broadcast %cst_33 : f32 to vector<8x128xf32>
    %82 = arith.addf %81, %80 : vector<8x128xf32>
    %83 = arith.divf %81, %82 : vector<8x128xf32>
    %c96_i32_34 = arith.constant 96 : i32
    %84 = tpu.dynamic_rotate %83 by %c96_i32_34 dim 1 : vector<8x128xf32>, i32 -> vector<8x128xf32>
    %c64_i32_35 = arith.constant 64 : i32
    %85 = tpu.dynamic_rotate %83 by %c64_i32_35 dim 1 : vector<8x128xf32>, i32 -> vector<8x128xf32>
    %c32_i32_36 = arith.constant 32 : i32
    %86 = tpu.dynamic_rotate %83 by %c32_i32_36 dim 1 : vector<8x128xf32>, i32 -> vector<8x128xf32>
    %87 = arith.mulf %84, %71 : vector<8x128xf32>
    %cst_37 = arith.constant 2.000000e+00 : f32
    %88 = vector.broadcast %cst_37 : f32 to vector<8x128xf32>
    %89 = arith.mulf %88, %85 : vector<8x128xf32>
    %cst_38 = arith.constant 1.000000e+00 : f32
    %90 = vector.broadcast %cst_38 : f32 to vector<8x128xf32>
    %91 = arith.subf %89, %90 : vector<8x128xf32>
    %92 = arith.mulf %83, %91 : vector<8x128xf32>
    %93 = arith.addf %87, %92 : vector<8x128xf32>
    %94 = math.tanh %93 : vector<8x128xf32>
    %95 = arith.mulf %86, %94 : vector<8x128xf32>
    %c24 = arith.constant 24 : index
    %c0_39 = arith.constant 0 : index
    %96 = vector.load %arg10[%c24, %c0_39] : memref<64x128xf32, #tpu.memory_space<vmem>>, vector<8x128xf32>
    tpu.vector_store %arg10[%c24, %c0_39], %95 {strides = array<i32>} : memref<64x128xf32, #tpu.memory_space<vmem>>, vector<8x128xf32>,
    %97 = vector.extract_strided_slice %7 {offsets = [32, 0], sizes = [8, 128], strides = [1, 1]} : vector<64x128xf32> to vector<8x128xf32>
    %98 = arith.truncf %95 : vector<8x128xf32> to vector<8x128xbf16>
    %cst_40 = arith.constant dense<0.000000e+00> : vector<8x128xf32>
    %99 = tpu.matmul %98, %0, %cst_40 {dimension_numbers = #tpu.dot_dimension_numbers<[1], [0], [0], [1], [0, 0, 1, 1], [], []>} : vector<8x128xbf16>, vector<128x128xbf16>, vector<8x128xf32> -> vector<8x128xf32>
    %100 = arith.addf %97, %99 : vector<8x128xf32>
    %101 = arith.negf %100 : vector<8x128xf32>
    %102 = math.exp %101 : vector<8x128xf32>
    %cst_41 = arith.constant 1.000000e+00 : f32
    %103 = vector.broadcast %cst_41 : f32 to vector<8x128xf32>
    %104 = arith.addf %103, %102 : vector<8x128xf32>
    %105 = arith.divf %103, %104 : vector<8x128xf32>
    %c96_i32_42 = arith.constant 96 : i32
    %106 = tpu.dynamic_rotate %105 by %c96_i32_42 dim 1 : vector<8x128xf32>, i32 -> vector<8x128xf32>
    %c64_i32_43 = arith.constant 64 : i32
    %107 = tpu.dynamic_rotate %105 by %c64_i32_43 dim 1 : vector<8x128xf32>, i32 -> vector<8x128xf32>
    %c32_i32_44 = arith.constant 32 : i32
    %108 = tpu.dynamic_rotate %105 by %c32_i32_44 dim 1 : vector<8x128xf32>, i32 -> vector<8x128xf32>
    %109 = arith.mulf %106, %93 : vector<8x128xf32>
    %cst_45 = arith.constant 2.000000e+00 : f32
    %110 = vector.broadcast %cst_45 : f32 to vector<8x128xf32>
    %111 = arith.mulf %110, %107 : vector<8x128xf32>
    %cst_46 = arith.constant 1.000000e+00 : f32
    %112 = vector.broadcast %cst_46 : f32 to vector<8x128xf32>
    %113 = arith.subf %111, %112 : vector<8x128xf32>
    %114 = arith.mulf %105, %113 : vector<8x128xf32>
    %115 = arith.addf %109, %114 : vector<8x128xf32>
    %116 = math.tanh %115 : vector<8x128xf32>
    %117 = arith.mulf %108, %116 : vector<8x128xf32>
    %c32 = arith.constant 32 : index
    %c0_47 = arith.constant 0 : index
    %118 = vector.load %arg10[%c32, %c0_47] : memref<64x128xf32, #tpu.memory_space<vmem>>, vector<8x128xf32>
    tpu.vector_store %arg10[%c32, %c0_47], %117 {strides = array<i32>} : memref<64x128xf32, #tpu.memory_space<vmem>>, vector<8x128xf32>,
    %119 = vector.extract_strided_slice %7 {offsets = [40, 0], sizes = [8, 128], strides = [1, 1]} : vector<64x128xf32> to vector<8x128xf32>
    %120 = arith.truncf %117 : vector<8x128xf32> to vector<8x128xbf16>
    %cst_48 = arith.constant dense<0.000000e+00> : vector<8x128xf32>
    %121 = tpu.matmul %120, %0, %cst_48 {dimension_numbers = #tpu.dot_dimension_numbers<[1], [0], [0], [1], [0, 0, 1, 1], [], []>} : vector<8x128xbf16>, vector<128x128xbf16>, vector<8x128xf32> -> vector<8x128xf32>
    %122 = arith.addf %119, %121 : vector<8x128xf32>
    %123 = arith.negf %122 : vector<8x128xf32>
    %124 = math.exp %123 : vector<8x128xf32>
    %cst_49 = arith.constant 1.000000e+00 : f32
    %125 = vector.broadcast %cst_49 : f32 to vector<8x128xf32>
    %126 = arith.addf %125, %124 : vector<8x128xf32>
    %127 = arith.divf %125, %126 : vector<8x128xf32>
    %c96_i32_50 = arith.constant 96 : i32
    %128 = tpu.dynamic_rotate %127 by %c96_i32_50 dim 1 : vector<8x128xf32>, i32 -> vector<8x128xf32>
    %c64_i32_51 = arith.constant 64 : i32
    %129 = tpu.dynamic_rotate %127 by %c64_i32_51 dim 1 : vector<8x128xf32>, i32 -> vector<8x128xf32>
    %c32_i32_52 = arith.constant 32 : i32
    %130 = tpu.dynamic_rotate %127 by %c32_i32_52 dim 1 : vector<8x128xf32>, i32 -> vector<8x128xf32>
    %131 = arith.mulf %128, %115 : vector<8x128xf32>
    %cst_53 = arith.constant 2.000000e+00 : f32
    %132 = vector.broadcast %cst_53 : f32 to vector<8x128xf32>
    %133 = arith.mulf %132, %129 : vector<8x128xf32>
    %cst_54 = arith.constant 1.000000e+00 : f32
    %134 = vector.broadcast %cst_54 : f32 to vector<8x128xf32>
    %135 = arith.subf %133, %134 : vector<8x128xf32>
    %136 = arith.mulf %127, %135 : vector<8x128xf32>
    %137 = arith.addf %131, %136 : vector<8x128xf32>
    %138 = math.tanh %137 : vector<8x128xf32>
    %139 = arith.mulf %130, %138 : vector<8x128xf32>
    %c40 = arith.constant 40 : index
    %c0_55 = arith.constant 0 : index
    %140 = vector.load %arg10[%c40, %c0_55] : memref<64x128xf32, #tpu.memory_space<vmem>>, vector<8x128xf32>
    tpu.vector_store %arg10[%c40, %c0_55], %139 {strides = array<i32>} : memref<64x128xf32, #tpu.memory_space<vmem>>, vector<8x128xf32>,
    %141 = vector.extract_strided_slice %7 {offsets = [48, 0], sizes = [8, 128], strides = [1, 1]} : vector<64x128xf32> to vector<8x128xf32>
    %142 = arith.truncf %139 : vector<8x128xf32> to vector<8x128xbf16>
    %cst_56 = arith.constant dense<0.000000e+00> : vector<8x128xf32>
    %143 = tpu.matmul %142, %0, %cst_56 {dimension_numbers = #tpu.dot_dimension_numbers<[1], [0], [0], [1], [0, 0, 1, 1], [], []>} : vector<8x128xbf16>, vector<128x128xbf16>, vector<8x128xf32> -> vector<8x128xf32>
    %144 = arith.addf %141, %143 : vector<8x128xf32>
    %145 = arith.negf %144 : vector<8x128xf32>
    %146 = math.exp %145 : vector<8x128xf32>
    %cst_57 = arith.constant 1.000000e+00 : f32
    %147 = vector.broadcast %cst_57 : f32 to vector<8x128xf32>
    %148 = arith.addf %147, %146 : vector<8x128xf32>
    %149 = arith.divf %147, %148 : vector<8x128xf32>
    %c96_i32_58 = arith.constant 96 : i32
    %150 = tpu.dynamic_rotate %149 by %c96_i32_58 dim 1 : vector<8x128xf32>, i32 -> vector<8x128xf32>
    %c64_i32_59 = arith.constant 64 : i32
    %151 = tpu.dynamic_rotate %149 by %c64_i32_59 dim 1 : vector<8x128xf32>, i32 -> vector<8x128xf32>
    %c32_i32_60 = arith.constant 32 : i32
    %152 = tpu.dynamic_rotate %149 by %c32_i32_60 dim 1 : vector<8x128xf32>, i32 -> vector<8x128xf32>
    %153 = arith.mulf %150, %137 : vector<8x128xf32>
    %cst_61 = arith.constant 2.000000e+00 : f32
    %154 = vector.broadcast %cst_61 : f32 to vector<8x128xf32>
    %155 = arith.mulf %154, %151 : vector<8x128xf32>
    %cst_62 = arith.constant 1.000000e+00 : f32
    %156 = vector.broadcast %cst_62 : f32 to vector<8x128xf32>
    %157 = arith.subf %155, %156 : vector<8x128xf32>
    %158 = arith.mulf %149, %157 : vector<8x128xf32>
    %159 = arith.addf %153, %158 : vector<8x128xf32>
    %160 = math.tanh %159 : vector<8x128xf32>
    %161 = arith.mulf %152, %160 : vector<8x128xf32>
    %c48 = arith.constant 48 : index
    %c0_63 = arith.constant 0 : index
    %162 = vector.load %arg10[%c48, %c0_63] : memref<64x128xf32, #tpu.memory_space<vmem>>, vector<8x128xf32>
    tpu.vector_store %arg10[%c48, %c0_63], %161 {strides = array<i32>} : memref<64x128xf32, #tpu.memory_space<vmem>>, vector<8x128xf32>,
    %163 = vector.extract_strided_slice %7 {offsets = [56, 0], sizes = [8, 128], strides = [1, 1]} : vector<64x128xf32> to vector<8x128xf32>
    %164 = arith.truncf %161 : vector<8x128xf32> to vector<8x128xbf16>
    %cst_64 = arith.constant dense<0.000000e+00> : vector<8x128xf32>
    %165 = tpu.matmul %164, %0, %cst_64 {dimension_numbers = #tpu.dot_dimension_numbers<[1], [0], [0], [1], [0, 0, 1, 1], [], []>} : vector<8x128xbf16>, vector<128x128xbf16>, vector<8x128xf32> -> vector<8x128xf32>
    %166 = arith.addf %163, %165 : vector<8x128xf32>
    %167 = arith.negf %166 : vector<8x128xf32>
    %168 = math.exp %167 : vector<8x128xf32>
    %cst_65 = arith.constant 1.000000e+00 : f32
    %169 = vector.broadcast %cst_65 : f32 to vector<8x128xf32>
    %170 = arith.addf %169, %168 : vector<8x128xf32>
    %171 = arith.divf %169, %170 : vector<8x128xf32>
    %c96_i32_66 = arith.constant 96 : i32
    %172 = tpu.dynamic_rotate %171 by %c96_i32_66 dim 1 : vector<8x128xf32>, i32 -> vector<8x128xf32>
    %c64_i32_67 = arith.constant 64 : i32
    %173 = tpu.dynamic_rotate %171 by %c64_i32_67 dim 1 : vector<8x128xf32>, i32 -> vector<8x128xf32>
    %c32_i32_68 = arith.constant 32 : i32
    %174 = tpu.dynamic_rotate %171 by %c32_i32_68 dim 1 : vector<8x128xf32>, i32 -> vector<8x128xf32>
    %175 = arith.mulf %172, %159 : vector<8x128xf32>
    %cst_69 = arith.constant 2.000000e+00 : f32
    %176 = vector.broadcast %cst_69 : f32 to vector<8x128xf32>
    %177 = arith.mulf %176, %173 : vector<8x128xf32>
    %cst_70 = arith.constant 1.000000e+00 : f32
    %178 = vector.broadcast %cst_70 : f32 to vector<8x128xf32>
    %179 = arith.subf %177, %178 : vector<8x128xf32>
    %180 = arith.mulf %171, %179 : vector<8x128xf32>
    %181 = arith.addf %175, %180 : vector<8x128xf32>
    %182 = math.tanh %181 : vector<8x128xf32>
    %183 = arith.mulf %174, %182 : vector<8x128xf32>
    %c56 = arith.constant 56 : index
    %c0_71 = arith.constant 0 : index
    %184 = vector.load %arg10[%c56, %c0_71] : memref<64x128xf32, #tpu.memory_space<vmem>>, vector<8x128xf32>
    tpu.vector_store %arg10[%c56, %c0_71], %183 {strides = array<i32>} : memref<64x128xf32, #tpu.memory_space<vmem>>, vector<8x128xf32>,
    %c0_72 = arith.constant 0 : index
    %c0_73 = arith.constant 0 : index
    %185 = vector.load %arg10[%c0_72, %c0_73] : memref<64x128xf32, #tpu.memory_space<vmem>>, vector<64x128xf32>
    %186 = arith.truncf %185 : vector<64x128xf32> to vector<64x128xbf16>
    %c0_74 = arith.constant 0 : index
    %c0_75 = arith.constant 0 : index
    %187 = vector.load %arg4[%c0_74, %c0_75] : memref<128x128xbf16, #tpu.memory_space<vmem>>, vector<128x128xbf16>
    %cst_76 = arith.constant dense<0.000000e+00> : vector<64x128xf32>
    %188 = tpu.matmul %186, %187, %cst_76 {dimension_numbers = #tpu.dot_dimension_numbers<[1], [0], [0], [1], [0, 0, 1, 1], [], []>} : vector<64x128xbf16>, vector<128x128xbf16>, vector<64x128xf32> -> vector<64x128xf32>
    %c0_77 = arith.constant 0 : index
    %c0_78 = arith.constant 0 : index
    %189 = vector.load %arg6[%c0_77, %c0_78] : memref<1x128xf32, #tpu.memory_space<vmem>>, vector<1x128xf32>
    %190 = vector.broadcast %189 : vector<1x128xf32> to vector<64x128xf32>
    %191 = arith.addf %188, %190 : vector<64x128xf32>
    %192 = vector.extract_strided_slice %191 {offsets = [0, 0], sizes = [8, 128], strides = [1, 1]} : vector<64x128xf32> to vector<8x128xf32>
    %193 = arith.truncf %183 : vector<8x128xf32> to vector<8x128xbf16>
    %cst_79 = arith.constant dense<0.000000e+00> : vector<8x128xf32>
    %194 = tpu.matmul %193, %1, %cst_79 {dimension_numbers = #tpu.dot_dimension_numbers<[1], [0], [0], [1], [0, 0, 1, 1], [], []>} : vector<8x128xbf16>, vector<128x128xbf16>, vector<8x128xf32> -> vector<8x128xf32>
    %195 = arith.addf %192, %194 : vector<8x128xf32>
    %196 = arith.negf %195 : vector<8x128xf32>
    %197 = math.exp %196 : vector<8x128xf32>
    %cst_80 = arith.constant 1.000000e+00 : f32
    %198 = vector.broadcast %cst_80 : f32 to vector<8x128xf32>
    %199 = arith.addf %198, %197 : vector<8x128xf32>
    %200 = arith.divf %198, %199 : vector<8x128xf32>
    %c96_i32_81 = arith.constant 96 : i32
    %201 = tpu.dynamic_rotate %200 by %c96_i32_81 dim 1 : vector<8x128xf32>, i32 -> vector<8x128xf32>
    %c64_i32_82 = arith.constant 64 : i32
    %202 = tpu.dynamic_rotate %200 by %c64_i32_82 dim 1 : vector<8x128xf32>, i32 -> vector<8x128xf32>
    %c32_i32_83 = arith.constant 32 : i32
    %203 = tpu.dynamic_rotate %200 by %c32_i32_83 dim 1 : vector<8x128xf32>, i32 -> vector<8x128xf32>
    %204 = arith.mulf %201, %181 : vector<8x128xf32>
    %cst_84 = arith.constant 2.000000e+00 : f32
    %205 = vector.broadcast %cst_84 : f32 to vector<8x128xf32>
    %206 = arith.mulf %205, %202 : vector<8x128xf32>
    %cst_85 = arith.constant 1.000000e+00 : f32
    %207 = vector.broadcast %cst_85 : f32 to vector<8x128xf32>
    %208 = arith.subf %206, %207 : vector<8x128xf32>
    %209 = arith.mulf %200, %208 : vector<8x128xf32>
    %210 = arith.addf %204, %209 : vector<8x128xf32>
    %211 = math.tanh %210 : vector<8x128xf32>
    %212 = arith.mulf %203, %211 : vector<8x128xf32>
    %213 = vector.extract_strided_slice %191 {offsets = [8, 0], sizes = [8, 128], strides = [1, 1]} : vector<64x128xf32> to vector<8x128xf32>
    %214 = arith.truncf %212 : vector<8x128xf32> to vector<8x128xbf16>
    %cst_86 = arith.constant dense<0.000000e+00> : vector<8x128xf32>
    %215 = tpu.matmul %214, %1, %cst_86 {dimension_numbers = #tpu.dot_dimension_numbers<[1], [0], [0], [1], [0, 0, 1, 1], [], []>} : vector<8x128xbf16>, vector<128x128xbf16>, vector<8x128xf32> -> vector<8x128xf32>
    %216 = arith.addf %213, %215 : vector<8x128xf32>
    %217 = arith.negf %216 : vector<8x128xf32>
    %218 = math.exp %217 : vector<8x128xf32>
    %cst_87 = arith.constant 1.000000e+00 : f32
    %219 = vector.broadcast %cst_87 : f32 to vector<8x128xf32>
    %220 = arith.addf %219, %218 : vector<8x128xf32>
    %221 = arith.divf %219, %220 : vector<8x128xf32>
    %c96_i32_88 = arith.constant 96 : i32
    %222 = tpu.dynamic_rotate %221 by %c96_i32_88 dim 1 : vector<8x128xf32>, i32 -> vector<8x128xf32>
    %c64_i32_89 = arith.constant 64 : i32
    %223 = tpu.dynamic_rotate %221 by %c64_i32_89 dim 1 : vector<8x128xf32>, i32 -> vector<8x128xf32>
    %c32_i32_90 = arith.constant 32 : i32
    %224 = tpu.dynamic_rotate %221 by %c32_i32_90 dim 1 : vector<8x128xf32>, i32 -> vector<8x128xf32>
    %225 = arith.mulf %222, %210 : vector<8x128xf32>
    %cst_91 = arith.constant 2.000000e+00 : f32
    %226 = vector.broadcast %cst_91 : f32 to vector<8x128xf32>
    %227 = arith.mulf %226, %223 : vector<8x128xf32>
    %cst_92 = arith.constant 1.000000e+00 : f32
    %228 = vector.broadcast %cst_92 : f32 to vector<8x128xf32>
    %229 = arith.subf %227, %228 : vector<8x128xf32>
    %230 = arith.mulf %221, %229 : vector<8x128xf32>
    %231 = arith.addf %225, %230 : vector<8x128xf32>
    %232 = math.tanh %231 : vector<8x128xf32>
    %233 = arith.mulf %224, %232 : vector<8x128xf32>
    %234 = vector.extract_strided_slice %191 {offsets = [16, 0], sizes = [8, 128], strides = [1, 1]} : vector<64x128xf32> to vector<8x128xf32>
    %235 = arith.truncf %233 : vector<8x128xf32> to vector<8x128xbf16>
    %cst_93 = arith.constant dense<0.000000e+00> : vector<8x128xf32>
    %236 = tpu.matmul %235, %1, %cst_93 {dimension_numbers = #tpu.dot_dimension_numbers<[1], [0], [0], [1], [0, 0, 1, 1], [], []>} : vector<8x128xbf16>, vector<128x128xbf16>, vector<8x128xf32> -> vector<8x128xf32>
    %237 = arith.addf %234, %236 : vector<8x128xf32>
    %238 = arith.negf %237 : vector<8x128xf32>
    %239 = math.exp %238 : vector<8x128xf32>
    %cst_94 = arith.constant 1.000000e+00 : f32
    %240 = vector.broadcast %cst_94 : f32 to vector<8x128xf32>
    %241 = arith.addf %240, %239 : vector<8x128xf32>
    %242 = arith.divf %240, %241 : vector<8x128xf32>
    %c96_i32_95 = arith.constant 96 : i32
    %243 = tpu.dynamic_rotate %242 by %c96_i32_95 dim 1 : vector<8x128xf32>, i32 -> vector<8x128xf32>
    %c64_i32_96 = arith.constant 64 : i32
    %244 = tpu.dynamic_rotate %242 by %c64_i32_96 dim 1 : vector<8x128xf32>, i32 -> vector<8x128xf32>
    %c32_i32_97 = arith.constant 32 : i32
    %245 = tpu.dynamic_rotate %242 by %c32_i32_97 dim 1 : vector<8x128xf32>, i32 -> vector<8x128xf32>
    %246 = arith.mulf %243, %231 : vector<8x128xf32>
    %cst_98 = arith.constant 2.000000e+00 : f32
    %247 = vector.broadcast %cst_98 : f32 to vector<8x128xf32>
    %248 = arith.mulf %247, %244 : vector<8x128xf32>
    %cst_99 = arith.constant 1.000000e+00 : f32
    %249 = vector.broadcast %cst_99 : f32 to vector<8x128xf32>
    %250 = arith.subf %248, %249 : vector<8x128xf32>
    %251 = arith.mulf %242, %250 : vector<8x128xf32>
    %252 = arith.addf %246, %251 : vector<8x128xf32>
    %253 = math.tanh %252 : vector<8x128xf32>
    %254 = arith.mulf %245, %253 : vector<8x128xf32>
    %255 = vector.extract_strided_slice %191 {offsets = [24, 0], sizes = [8, 128], strides = [1, 1]} : vector<64x128xf32> to vector<8x128xf32>
    %256 = arith.truncf %254 : vector<8x128xf32> to vector<8x128xbf16>
    %cst_100 = arith.constant dense<0.000000e+00> : vector<8x128xf32>
    %257 = tpu.matmul %256, %1, %cst_100 {dimension_numbers = #tpu.dot_dimension_numbers<[1], [0], [0], [1], [0, 0, 1, 1], [], []>} : vector<8x128xbf16>, vector<128x128xbf16>, vector<8x128xf32> -> vector<8x128xf32>
    %258 = arith.addf %255, %257 : vector<8x128xf32>
    %259 = arith.negf %258 : vector<8x128xf32>
    %260 = math.exp %259 : vector<8x128xf32>
    %cst_101 = arith.constant 1.000000e+00 : f32
    %261 = vector.broadcast %cst_101 : f32 to vector<8x128xf32>
    %262 = arith.addf %261, %260 : vector<8x128xf32>
    %263 = arith.divf %261, %262 : vector<8x128xf32>
    %c96_i32_102 = arith.constant 96 : i32
    %264 = tpu.dynamic_rotate %263 by %c96_i32_102 dim 1 : vector<8x128xf32>, i32 -> vector<8x128xf32>
    %c64_i32_103 = arith.constant 64 : i32
    %265 = tpu.dynamic_rotate %263 by %c64_i32_103 dim 1 : vector<8x128xf32>, i32 -> vector<8x128xf32>
    %c32_i32_104 = arith.constant 32 : i32
    %266 = tpu.dynamic_rotate %263 by %c32_i32_104 dim 1 : vector<8x128xf32>, i32 -> vector<8x128xf32>
    %267 = arith.mulf %264, %252 : vector<8x128xf32>
    %cst_105 = arith.constant 2.000000e+00 : f32
    %268 = vector.broadcast %cst_105 : f32 to vector<8x128xf32>
    %269 = arith.mulf %268, %265 : vector<8x128xf32>
    %cst_106 = arith.constant 1.000000e+00 : f32
    %270 = vector.broadcast %cst_106 : f32 to vector<8x128xf32>
    %271 = arith.subf %269, %270 : vector<8x128xf32>
    %272 = arith.mulf %263, %271 : vector<8x128xf32>
    %273 = arith.addf %267, %272 : vector<8x128xf32>
    %274 = math.tanh %273 : vector<8x128xf32>
    %275 = arith.mulf %266, %274 : vector<8x128xf32>
    %276 = vector.extract_strided_slice %191 {offsets = [32, 0], sizes = [8, 128], strides = [1, 1]} : vector<64x128xf32> to vector<8x128xf32>
    %277 = arith.truncf %275 : vector<8x128xf32> to vector<8x128xbf16>
    %cst_107 = arith.constant dense<0.000000e+00> : vector<8x128xf32>
    %278 = tpu.matmul %277, %1, %cst_107 {dimension_numbers = #tpu.dot_dimension_numbers<[1], [0], [0], [1], [0, 0, 1, 1], [], []>} : vector<8x128xbf16>, vector<128x128xbf16>, vector<8x128xf32> -> vector<8x128xf32>
    %279 = arith.addf %276, %278 : vector<8x128xf32>
    %280 = arith.negf %279 : vector<8x128xf32>
    %281 = math.exp %280 : vector<8x128xf32>
    %cst_108 = arith.constant 1.000000e+00 : f32
    %282 = vector.broadcast %cst_108 : f32 to vector<8x128xf32>
    %283 = arith.addf %282, %281 : vector<8x128xf32>
    %284 = arith.divf %282, %283 : vector<8x128xf32>
    %c96_i32_109 = arith.constant 96 : i32
    %285 = tpu.dynamic_rotate %284 by %c96_i32_109 dim 1 : vector<8x128xf32>, i32 -> vector<8x128xf32>
    %c64_i32_110 = arith.constant 64 : i32
    %286 = tpu.dynamic_rotate %284 by %c64_i32_110 dim 1 : vector<8x128xf32>, i32 -> vector<8x128xf32>
    %c32_i32_111 = arith.constant 32 : i32
    %287 = tpu.dynamic_rotate %284 by %c32_i32_111 dim 1 : vector<8x128xf32>, i32 -> vector<8x128xf32>
    %288 = arith.mulf %285, %273 : vector<8x128xf32>
    %cst_112 = arith.constant 2.000000e+00 : f32
    %289 = vector.broadcast %cst_112 : f32 to vector<8x128xf32>
    %290 = arith.mulf %289, %286 : vector<8x128xf32>
    %cst_113 = arith.constant 1.000000e+00 : f32
    %291 = vector.broadcast %cst_113 : f32 to vector<8x128xf32>
    %292 = arith.subf %290, %291 : vector<8x128xf32>
    %293 = arith.mulf %284, %292 : vector<8x128xf32>
    %294 = arith.addf %288, %293 : vector<8x128xf32>
    %295 = math.tanh %294 : vector<8x128xf32>
    %296 = arith.mulf %287, %295 : vector<8x128xf32>
    %297 = vector.extract_strided_slice %191 {offsets = [40, 0], sizes = [8, 128], strides = [1, 1]} : vector<64x128xf32> to vector<8x128xf32>
    %298 = arith.truncf %296 : vector<8x128xf32> to vector<8x128xbf16>
    %cst_114 = arith.constant dense<0.000000e+00> : vector<8x128xf32>
    %299 = tpu.matmul %298, %1, %cst_114 {dimension_numbers = #tpu.dot_dimension_numbers<[1], [0], [0], [1], [0, 0, 1, 1], [], []>} : vector<8x128xbf16>, vector<128x128xbf16>, vector<8x128xf32> -> vector<8x128xf32>
    %300 = arith.addf %297, %299 : vector<8x128xf32>
    %301 = arith.negf %300 : vector<8x128xf32>
    %302 = math.exp %301 : vector<8x128xf32>
    %cst_115 = arith.constant 1.000000e+00 : f32
    %303 = vector.broadcast %cst_115 : f32 to vector<8x128xf32>
    %304 = arith.addf %303, %302 : vector<8x128xf32>
    %305 = arith.divf %303, %304 : vector<8x128xf32>
    %c96_i32_116 = arith.constant 96 : i32
    %306 = tpu.dynamic_rotate %305 by %c96_i32_116 dim 1 : vector<8x128xf32>, i32 -> vector<8x128xf32>
    %c64_i32_117 = arith.constant 64 : i32
    %307 = tpu.dynamic_rotate %305 by %c64_i32_117 dim 1 : vector<8x128xf32>, i32 -> vector<8x128xf32>
    %c32_i32_118 = arith.constant 32 : i32
    %308 = tpu.dynamic_rotate %305 by %c32_i32_118 dim 1 : vector<8x128xf32>, i32 -> vector<8x128xf32>
    %309 = arith.mulf %306, %294 : vector<8x128xf32>
    %cst_119 = arith.constant 2.000000e+00 : f32
    %310 = vector.broadcast %cst_119 : f32 to vector<8x128xf32>
    %311 = arith.mulf %310, %307 : vector<8x128xf32>
    %cst_120 = arith.constant 1.000000e+00 : f32
    %312 = vector.broadcast %cst_120 : f32 to vector<8x128xf32>
    %313 = arith.subf %311, %312 : vector<8x128xf32>
    %314 = arith.mulf %305, %313 : vector<8x128xf32>
    %315 = arith.addf %309, %314 : vector<8x128xf32>
    %316 = math.tanh %315 : vector<8x128xf32>
    %317 = arith.mulf %308, %316 : vector<8x128xf32>
    %318 = vector.extract_strided_slice %191 {offsets = [48, 0], sizes = [8, 128], strides = [1, 1]} : vector<64x128xf32> to vector<8x128xf32>
    %319 = arith.truncf %317 : vector<8x128xf32> to vector<8x128xbf16>
    %cst_121 = arith.constant dense<0.000000e+00> : vector<8x128xf32>
    %320 = tpu.matmul %319, %1, %cst_121 {dimension_numbers = #tpu.dot_dimension_numbers<[1], [0], [0], [1], [0, 0, 1, 1], [], []>} : vector<8x128xbf16>, vector<128x128xbf16>, vector<8x128xf32> -> vector<8x128xf32>
    %321 = arith.addf %318, %320 : vector<8x128xf32>
    %322 = arith.negf %321 : vector<8x128xf32>
    %323 = math.exp %322 : vector<8x128xf32>
    %cst_122 = arith.constant 1.000000e+00 : f32
    %324 = vector.broadcast %cst_122 : f32 to vector<8x128xf32>
    %325 = arith.addf %324, %323 : vector<8x128xf32>
    %326 = arith.divf %324, %325 : vector<8x128xf32>
    %c96_i32_123 = arith.constant 96 : i32
    %327 = tpu.dynamic_rotate %326 by %c96_i32_123 dim 1 : vector<8x128xf32>, i32 -> vector<8x128xf32>
    %c64_i32_124 = arith.constant 64 : i32
    %328 = tpu.dynamic_rotate %326 by %c64_i32_124 dim 1 : vector<8x128xf32>, i32 -> vector<8x128xf32>
    %c32_i32_125 = arith.constant 32 : i32
    %329 = tpu.dynamic_rotate %326 by %c32_i32_125 dim 1 : vector<8x128xf32>, i32 -> vector<8x128xf32>
    %330 = arith.mulf %327, %315 : vector<8x128xf32>
    %cst_126 = arith.constant 2.000000e+00 : f32
    %331 = vector.broadcast %cst_126 : f32 to vector<8x128xf32>
    %332 = arith.mulf %331, %328 : vector<8x128xf32>
    %cst_127 = arith.constant 1.000000e+00 : f32
    %333 = vector.broadcast %cst_127 : f32 to vector<8x128xf32>
    %334 = arith.subf %332, %333 : vector<8x128xf32>
    %335 = arith.mulf %326, %334 : vector<8x128xf32>
    %336 = arith.addf %330, %335 : vector<8x128xf32>
    %337 = math.tanh %336 : vector<8x128xf32>
    %338 = arith.mulf %329, %337 : vector<8x128xf32>
    %339 = vector.extract_strided_slice %191 {offsets = [56, 0], sizes = [8, 128], strides = [1, 1]} : vector<64x128xf32> to vector<8x128xf32>
    %340 = arith.truncf %338 : vector<8x128xf32> to vector<8x128xbf16>
    %cst_128 = arith.constant dense<0.000000e+00> : vector<8x128xf32>
    %341 = tpu.matmul %340, %1, %cst_128 {dimension_numbers = #tpu.dot_dimension_numbers<[1], [0], [0], [1], [0, 0, 1, 1], [], []>} : vector<8x128xbf16>, vector<128x128xbf16>, vector<8x128xf32> -> vector<8x128xf32>
    %342 = arith.addf %339, %341 : vector<8x128xf32>
    %343 = arith.negf %342 : vector<8x128xf32>
    %344 = math.exp %343 : vector<8x128xf32>
    %cst_129 = arith.constant 1.000000e+00 : f32
    %345 = vector.broadcast %cst_129 : f32 to vector<8x128xf32>
    %346 = arith.addf %345, %344 : vector<8x128xf32>
    %347 = arith.divf %345, %346 : vector<8x128xf32>
    %c96_i32_130 = arith.constant 96 : i32
    %348 = tpu.dynamic_rotate %347 by %c96_i32_130 dim 1 : vector<8x128xf32>, i32 -> vector<8x128xf32>
    %c64_i32_131 = arith.constant 64 : i32
    %349 = tpu.dynamic_rotate %347 by %c64_i32_131 dim 1 : vector<8x128xf32>, i32 -> vector<8x128xf32>
    %c32_i32_132 = arith.constant 32 : i32
    %350 = tpu.dynamic_rotate %347 by %c32_i32_132 dim 1 : vector<8x128xf32>, i32 -> vector<8x128xf32>
    %351 = arith.mulf %348, %336 : vector<8x128xf32>
    %cst_133 = arith.constant 2.000000e+00 : f32
    %352 = vector.broadcast %cst_133 : f32 to vector<8x128xf32>
    %353 = arith.mulf %352, %349 : vector<8x128xf32>
    %cst_134 = arith.constant 1.000000e+00 : f32
    %354 = vector.broadcast %cst_134 : f32 to vector<8x128xf32>
    %355 = arith.subf %353, %354 : vector<8x128xf32>
    %356 = arith.mulf %347, %355 : vector<8x128xf32>
    %357 = arith.addf %351, %356 : vector<8x128xf32>
    %358 = math.tanh %357 : vector<8x128xf32>
    %359 = arith.mulf %350, %358 : vector<8x128xf32>
    %360 = arith.truncf %359 : vector<8x128xf32> to vector<8x128xbf16>
    %c0_135 = arith.constant 0 : index
    %c0_136 = arith.constant 0 : index
    %361 = vector.load %arg7[%c0_135, %c0_136] : memref<128x4xbf16, #tpu.memory_space<vmem>>, vector<128x4xbf16>
    %cst_137 = arith.constant dense<0.000000e+00> : vector<8x4xf32>
    %362 = tpu.matmul %360, %361, %cst_137 {dimension_numbers = #tpu.dot_dimension_numbers<[1], [0], [0], [1], [0, 0, 1, 1], [], []>} : vector<8x128xbf16>, vector<128x4xbf16>, vector<8x4xf32> -> vector<8x4xf32>
    %c0_138 = arith.constant 0 : index
    %c0_139 = arith.constant 0 : index
    %363 = vector.load %arg8[%c0_138, %c0_139] : memref<1x4xf32, #tpu.memory_space<vmem>>, vector<1x4xf32>
    %364 = vector.broadcast %363 : vector<1x4xf32> to vector<8x4xf32>
    %365 = arith.addf %362, %364 : vector<8x4xf32>
    %c0_140 = arith.constant 0 : index
    %c0_141 = arith.constant 0 : index
    %366 = vector.load %arg9[%c0_140, %c0_141] : memref<8x4xf32, #tpu.memory_space<vmem>>, vector<8x4xf32>
    tpu.vector_store %arg9[%c0_140, %c0_141], %365 {strides = array<i32>} : memref<8x4xf32, #tpu.memory_space<vmem>>, vector<8x4xf32>,
    return
  }
}

</mosaic_0001>

<bundles_post_ra>
// kernel: chaotic_predictor_forward.1
= control target key start
LH: loop header
LB: loop body
LE: loop exit
PB: predicated region body
PF: predicated region fallthrough
CT: control target
= control target key end

     0   :  { %v2290_v0 = vmov 0.0   ;;  %vm2291_vm0 = vmmov 0   ;;  %vm108_vm1 = vcmask 130048   ;;  %v2292_v12 = vmov 0   ;;  %s2294_s14 = smov 64   ;;  %s2295_s15 = smov 96   ;;  %s2947_s2 = inlined_call_operand.vmem [shape: bf16[128,128], index: 2, kind: input, shape index: {}]   ;;  %s2948_s1 = inlined_call_operand.vmem [shape: bf16[16,128], index: 1, kind: input, shape index: {}]   ;;  %s2949_s0 = inlined_call_operand.vmem [shape: bf16[64,16], index: 0, kind: input, shape index: {}]   ;;  %s2950_s3 = inlined_call_operand.vmem [shape: f32[1,128], index: 3, kind: input, shape index: {}]   ;;  %s2951_s4 = inlined_call_operand.vmem [shape: bf16[128,128], index: 4, kind: input, shape index: {}]   ;;  %s2952_s5 = inlined_call_operand.vmem [shape: bf16[128,128], index: 5, kind: input, shape index: {}]   ;;  %s2953_s6 = inlined_call_operand.vmem [shape: f32[1,128], index: 6, kind: input, shape index: {}]   ;;  %s2954_s7 = inlined_call_operand.vmem [shape: bf16[128,4], index: 7, kind: input, shape index: {}]   ;;  %s2955_s8 = inlined_call_operand.vmem [shape: f32[1,4], index: 8, kind: input, shape index: {}]   ;;  %s2956_s9 = inlined_call_operand.vmem [shape: f32[8,4], index: 9, kind: output, shape index: {}]  }
   0x1   :  { %1787 = vmatprep.subr.bf16.mxu1 %v2290_v0  ;;  %v2350_v1 = vld [vmem:[%s2947_s2] sm:$0xff]   ;;  %1803 = vmatprep.mubr.msk.bf16.mxu1 %vm2291_vm0, %v2290_v0  ;;  %v2358_v2 = vld [vmem:[%s2947_s2 + $0x8] sm:$0xff]   ;;  %v2364_v3 = vld [vmem:[%s2947_s2 + $0x10] sm:$0xff]   ;;  %vm1525_vm2 = vcmask 31744  }
   0x2   :  { %1788 = vmatpush3.bf16.msra.mxu1 %v2350_v1  ;;  %v2163_v4 = vld [vmem:[%s2948_s1] sm:$0xff]   ;;  %v2166_v6 = vld [vmem:[%s2949_s0 + $0x8] sm:$0xff]   ;;  %v2382_v7 = vld [vmem:[%s2947_s2 + $0x18] sm:$0xff]  }
   0x3   :  { %1789 = vmatprep.subr.bf16.mxu1 %v2290_v0  ;;  %v2164_v5 = vld [vmem:[%s2949_s0] sm:$0xff]   ;;  %1777 = vmatprep.subr.bf16.mxu0 %v2163_v4  ;;  %v2401_v9 = vld [vmem:[%s2947_s2 + $0x28] sm:$0xff]   ;;  %v2410_v10 = vld [vmem:[%s2947_s2 + $0x30] sm:$0xff]  }
   0x4   :  { %1778 = vmatpush3.bf16.msra.mxu0 %v2163_v4  ;;  %1779 = vmatprep.mubr.msk.bf16.mxu0 %vm108_vm1, %v2164_v5  ;;  %v2392_v8 = vld [vmem:[%s2947_s2 + $0x20] sm:$0xff]   ;;  %v2419_v11 = vld [vmem:[%s2947_s2 + $0x38] sm:$0xff]   ;;  %v2168_v27 = vld [vmem:[%s2949_s0 + $0x10] sm:$0xff]  }
   0x5   :  { %1807 = vmatprep.subr.bf16.mxu0 %v2290_v0  ;;  %v2458_v17 = vld [vmem:[%s2950_s3] ss:$0 sm:$0xff]  ;;  %v2169_v28 = vld [vmem:[%s2949_s0 + $0x18] sm:$0xff]   ;;  %s2293_s3 = smov 32  }
   0x6   :  { %1790 = vmatpush3.bf16.msra.mxu1 %v2358_v2 }
   0x7   :  { %1791 = vmatprep.subr.bf16.mxu1 %v2290_v0  ;;  %1780 = vmatmul.mubr.msk.bf16.vlgmr.msra.gmra.mrb[0].mxu0 %vm108_vm1, %v2166_v6 }
   0x8   :  { %1808 = vmatpush3.bf16.msra.mxu0 %v2350_v1  ;;  %1783 = vmatprep.mubr.msk.bf16.mxu0 %vm108_vm1, %v2168_v27 }
   0x9   :  { %1809 = vmatprep.subr.bf16.mxu0 %v2290_v0 }
   0xa   :  { %1792 = vmatpush3.bf16.msra.mxu1 %v2364_v3 }
   0xb   :  { %1793 = vmatprep.subr.bf16.mxu1 %v2290_v0 }
   0xc   :  { %1810 = vmatpush3.bf16.msra.mxu0 %v2358_v2 }
   0xd   :  { %1811 = vmatprep.subr.bf16.mxu0 %v2290_v0 }
   0xe   :  { %1794 = vmatpush3.bf16.msra.mxu1 %v2382_v7 }
   0xf   :  { %1795 = vmatprep.subr.bf16.mxu1 %v2290_v0  ;;  %1784 = vmatmul.mubr.msk.bf16.gmra.mrb[4].mxu0 %vm108_vm1, %v2169_v28 }
  0x10   :  { %1812 = vmatpush3.bf16.msra.mxu0 %v2364_v3  ;;  %1823 = vmatprep.mubr.msk.bf16.mxu0 %vm2291_vm0, %v2290_v0 }
  0x11   :  { %1813 = vmatprep.subr.bf16.mxu0 %v2290_v0 }
  0x12   :  { %1796 = vmatpush3.bf16.msra.mxu1 %v2392_v8 }
  0x13   :  { %1797 = vmatprep.subr.bf16.mxu1 %v2290_v0 }
  0x14   :  { %1814 = vmatpush3.bf16.msra.mxu0 %v2382_v7 }
  0x15   :  { %1815 = vmatprep.subr.bf16.mxu0 %v2290_v0 }
  0x16   :  { %1798 = vmatpush3.bf16.msra.mxu1 %v2401_v9 }
  0x17   :  { %1799 = vmatprep.subr.bf16.mxu1 %v2290_v0 }
  0x18   :  { %1816 = vmatpush3.bf16.msra.mxu0 %v2392_v8 }
  0x19   :  { %1817 = vmatprep.subr.bf16.mxu0 %v2290_v0 }
  0x1a   :  { %1800 = vmatpush3.bf16.msra.mxu1 %v2410_v10 }
  0x1b   :  { %1801 = vmatprep.subr.bf16.mxu1 %v2290_v0 }
  0x1c   :  { %1818 = vmatpush3.bf16.msra.mxu0 %v2401_v9 }
  0x1d   :  { %1819 = vmatprep.subr.bf16.mxu0 %v2290_v0 }
  0x1e   :  { %1802 = vmatpush3.bf16.msra.mxu1 %v2419_v11 }
  0x1f   :  { %1827 = vmatprep.subr.bf16.mxu1 %v2290_v0 }
  0x20   :  { %1820 = vmatpush3.bf16.msra.mxu0 %v2410_v10 }
  0x21   :  { %1804 = vmatmul.mubr.bf16.vlgmr.msra.gmra.mrb[0].mxu1 %v2292_v12  ;;  %1821 = vmatprep.subr.bf16.mxu0 %v2290_v0 }
  0x22   :  { %1828 = vmatpush3.bf16.msra.mxu1 %v2350_v1  ;;  %1843 = vmatprep.mubr.msk.bf16.mxu1 %vm2291_vm0, %v2290_v0 }
  0x23   :  { %1829 = vmatprep.subr.bf16.mxu1 %v2290_v0 }
  0x24   :  { %1822 = vmatpush3.bf16.msra.mxu0 %v2419_v11 }
  0x25   :  { %1847 = vmatprep.subr.bf16.mxu0 %v2290_v0 }
  0x26   :  { %1830 = vmatpush3.bf16.msra.mxu1 %v2358_v2 }
  0x27   :  { %1831 = vmatprep.subr.bf16.mxu1 %v2290_v0 }
  0x2a   :  { %1832 = vmatpush3.bf16.msra.mxu1 %v2364_v3 }
  0x2b   :  { %1833 = vmatprep.subr.bf16.mxu1 %v2290_v0 }
  0x2e   :  { %1834 = vmatpush3.bf16.msra.mxu1 %v2382_v7 }
  0x2f   :  { %1835 = vmatprep.subr.bf16.mxu1 %v2290_v0 }
  0x32   :  { %1836 = vmatpush3.bf16.msra.mxu1 %v2392_v8 }
  0x33   :  { %1837 = vmatprep.subr.bf16.mxu1 %v2290_v0 }
  0x36   :  { %1838 = vmatpush3.bf16.msra.mxu1 %v2401_v9 }
  0x37   :  { %1839 = vmatprep.subr.bf16.mxu1 %v2290_v0 }
  0x3a   :  { %1840 = vmatpush3.bf16.msra.mxu1 %v2410_v10 }
  0x3b   :  { %1841 = vmatprep.subr.bf16.mxu1 %v2290_v0 }
  0x3e   :  { %1842 = vmatpush3.bf16.msra.mxu1 %v2419_v11 }
  0x3f   :  { %1867 = vmatprep.subr.bf16.mxu1 %v2290_v0 }
  0xda   :  { %v2451_v13 = vpop.f32.mrb[0].mxu0 }
  0xdb   :  { %v155_v14 = vpop.f32.mrb[1].mxu0  ;;  %v164_v6 = vadd.f32 %v2451_v13, %v2458_v17 }
  0xdc   :  { %v2453_v15 = vpop.f32.mrb[2].mxu0  ;;  %v156_v18 = vadd.f32 %v2458_v17, %v155_v14 }
  0xdd   :  { %v158_v16 = vpop.f32.mrb[3].mxu0 }
  0xde   :  { %v159_v45 = vadd.f32 %v2458_v17, %v158_v16 }
  0xe2   :  { %v2496_v41 = vpop.f32.mrb[4].mxu0 }
  0xe3   :  { %v2498_v42 = vpop.f32.mrb[5].mxu0 }
  0xe4   :  { %v2500_v43 = vpop.f32.mrb[6].mxu0 }
  0xe5   :  { %v2502_v44 = vpop.f32.mrb[7].mxu0 }
  0xf4   :  { %v268_v19 = vpop.f32.mrb[0].mxu1 }
  0xf5   :  { %v274_v20 = vadd.f32 %v268_v19, %v156_v18  ;;  %v1805_v21 = vpop.f32.mrb[1].mxu1 }
  0xf6   :  { %v271_v22 = vpop.f32.mrb[2].mxu1 }
  0xf7   :  { %v1549_v23 = vmul.f32 -1.442695, %v274_v20  ;;  %v1806_v24 = vpop.f32.mrb[3].mxu1 }
  0xf9   :  { %2194 = vpow2.f32 %v1549_v23 }
 0x103   :  { %v2195_v25 = vpop.eup %2194 }
 0x104   :  { %v278_v26 = vadd.f32 1.0, %v2195_v25 }
 0x106   :  { %2196 = vrcp.f32 %v278_v26 }
 0x110   :  { %v2197_v29 = vpop.eup %2196 }
 0x111   :  { %285 = vrot.lane.b32.xlu1 %v2197_v29, %s2293_s3  ;;  %283 = vrot.lane.b32.xlu0 %v2197_v29, %s2294_s14 }
 0x115   :  { %281 = vrot.lane.b32.xlu0 %v2197_v29, %s2295_s15 }
 0x183   :  { %v284_v30 = vpop.permute.xlu0 %283  ;;  %v286_v38 = vpop.permute.xlu1 %285 }
 0x184   :  { %v288_v31 = vmul.f32 2.0, %v284_v30 }
 0x186   :  { %v1550_v32 = vadd.f32 -1.0, %v288_v31 }
 0x187   :  { %v282_v33 = vpop.permute.xlu0 %281 }
 0x188   :  { %v290_v34 = vmul.f32 %v2197_v29, %v1550_v32  ;;  %v287_v35 = vmul.f32 0.0, %v282_v33 }
 0x18a   :  { %v291_v36 = vadd.f32 %v290_v34, %v287_v35  ;;  %v167_v34 = vadd.f32 %v2453_v15, %v2458_v17 }
 0x18c   :  { %2198 = vtanh.f32 %v291_v36 }
 0x196   :  { %v2199_v37 = vpop.eup %2198 }
 0x197   :  { %v2474_v39 = vmul.f32 %v2199_v37, %v286_v38 }
 0x199   :  { %v295_v40 = vpack.c.bf16 %v2474_v39, %v2474_v39 }
 0x19b   :  { %1824 = vmatmul.mubr.bf16.vlgmr.msra.gmra.mrb[8].mxu0 %v295_v40 }
 0x19c   :  { %1848 = vmatpush3.bf16.msra.mxu0 %v2350_v1  ;;  %1863 = vmatprep.mubr.msk.bf16.mxu0 %vm2291_vm0, %v2290_v0 }
 0x19d   :  { %1849 = vmatprep.subr.bf16.mxu0 %v2290_v0 }
 0x1a0   :  { %1850 = vmatpush3.bf16.msra.mxu0 %v2358_v2 }
 0x1a1   :  { %1851 = vmatprep.subr.bf16.mxu0 %v2290_v0 }
 0x1a4   :  { %1852 = vmatpush3.bf16.msra.mxu0 %v2364_v3 }
 0x1a5   :  { %1853 = vmatprep.subr.bf16.mxu0 %v2290_v0 }
 0x1a8   :  { %1854 = vmatpush3.bf16.msra.mxu0 %v2382_v7 }
 0x1a9   :  { %1855 = vmatprep.subr.bf16.mxu0 %v2290_v0 }
 0x1ac   :  { %1856 = vmatpush3.bf16.msra.mxu0 %v2392_v8 }
 0x1ad   :  { %1857 = vmatprep.subr.bf16.mxu0 %v2290_v0 }
 0x1b0   :  { %1858 = vmatpush3.bf16.msra.mxu0 %v2401_v9 }
 0x1b1   :  { %1859 = vmatprep.subr.bf16.mxu0 %v2290_v0 }
 0x1b4   :  { %1860 = vmatpush3.bf16.msra.mxu0 %v2410_v10 }
 0x1b5   :  { %1861 = vmatprep.subr.bf16.mxu0 %v2290_v0 }
 0x1b8   :  { %1862 = vmatpush3.bf16.msra.mxu0 %v2419_v11 }
 0x1b9   :  { %1887 = vmatprep.subr.bf16.mxu0 %v2290_v0 }
 0x26e   :  { %v330_v46 = vpop.f32.mrb[8].mxu0 }
 0x26f   :  { %v336_v47 = vadd.f32 %v330_v46, %v159_v45  ;;  %v1825_v48 = vpop.f32.mrb[9].mxu0 }
 0x270   :  { %v333_v49 = vpop.f32.mrb[10].mxu0 }
 0x271   :  { %v1551_v50 = vmul.f32 -1.442695, %v336_v47  ;;  %v1826_v51 = vpop.f32.mrb[11].mxu0 }
 0x273   :  { %2200 = vpow2.f32 %v1551_v50 }
 0x27d   :  { %v2201_v52 = vpop.eup %2200 }
 0x27e   :  { %v340_v53 = vadd.f32 1.0, %v2201_v52 }
 0x280   :  { %2202 = vrcp.f32 %v340_v53 }
 0x28a   :  { %v2203_v54 = vpop.eup %2202 }
 0x28b   :  { %343 = vrot.lane.b32.xlu0 %v2203_v54, %s2295_s15  ;;  %345 = vrot.lane.b32.xlu1 %v2203_v54, %s2294_s14 }
 0x28f   :  { %347 = vrot.lane.b32.xlu1 %v2203_v54, %s2293_s3 }
 0x2fd   :  { %v346_v55 = vpop.permute.xlu1 %345  ;;  %v344_v57 = vpop.permute.xlu0 %343 }
 0x2fe   :  { %v350_v56 = vmul.f32 2.0, %v346_v55  ;;  %v349_v59 = vmul.f32 %v344_v57, %v291_v36 }
 0x300   :  { %v1552_v58 = vadd.f32 -1.0, %v350_v56 }
 0x301   :  { %v348_v63 = vpop.permute.xlu1 %347 }
 0x302   :  { %v352_v60 = vmul.f32 %v2203_v54, %v1552_v58 }
 0x304   :  { %v353_v61 = vadd.f32 %v352_v60, %v349_v59  ;;  %v172_v59 = vadd.f32 %v2458_v17, %v2498_v42 }
 0x306   :  { %2204 = vtanh.f32 %v353_v61 }
 0x310   :  { %v2205_v62 = vpop.eup %2204 }
 0x311   :  { %v2508_v4 = vmul.f32 %v2205_v62, %v348_v63 }
 0x313   :  { %v357_v5 = vpack.c.bf16 %v2508_v4, %v2508_v4 }
 0x315   :  { %1844 = vmatmul.mubr.bf16.vlgmr.msra.gmra.mrb[4].mxu1 %v357_v5 }
 0x316   :  { %1868 = vmatpush3.bf16.msra.mxu1 %v2350_v1  ;;  %1883 = vmatprep.mubr.msk.bf16.mxu1 %vm2291_vm0, %v2290_v0 }
 0x317   :  { %1869 = vmatprep.subr.bf16.mxu1 %v2290_v0 }
 0x31a   :  { %1870 = vmatpush3.bf16.msra.mxu1 %v2358_v2 }
 0x31b   :  { %1871 = vmatprep.subr.bf16.mxu1 %v2290_v0 }
 0x31e   :  { %1872 = vmatpush3.bf16.msra.mxu1 %v2364_v3 }
 0x31f   :  { %1873 = vmatprep.subr.bf16.mxu1 %v2290_v0 }
 0x322   :  { %1874 = vmatpush3.bf16.msra.mxu1 %v2382_v7 }
 0x323   :  { %1875 = vmatprep.subr.bf16.mxu1 %v2290_v0 }
 0x326   :  { %1876 = vmatpush3.bf16.msra.mxu1 %v2392_v8 }
 0x327   :  { %1877 = vmatprep.subr.bf16.mxu1 %v2290_v0 }
 0x32a   :  { %1878 = vmatpush3.bf16.msra.mxu1 %v2401_v9 }
 0x32b   :  { %1879 = vmatprep.subr.bf16.mxu1 %v2290_v0 }
 0x32e   :  { %1880 = vmatpush3.bf16.msra.mxu1 %v2410_v10 }
 0x32f   :  { %1881 = vmatprep.subr.bf16.mxu1 %v2290_v0 }
 0x332   :  { %1882 = vmatpush3.bf16.msra.mxu1 %v2419_v11 }
 0x333   :  { %1907 = vmatprep.subr.bf16.mxu1 %v2290_v0 }
 0x3e8   :  { %v392_v12 = vpop.f32.mrb[4].mxu1 }
 0x3e9   :  { %v398_v14 = vadd.f32 %v392_v12, %v164_v6  ;;  %v1845_v16 = vpop.f32.mrb[5].mxu1 }
 0x3ea   :  { %v395_v18 = vpop.f32.mrb[6].mxu1 }
 0x3eb   :  { %v1553_v19 = vmul.f32 -1.442695, %v398_v14  ;;  %v1846_v20 = vpop.f32.mrb[7].mxu1 }
 0x3ed   :  { %2206 = vpow2.f32 %v1553_v19 }
 0x3f7   :  { %v2207_v21 = vpop.eup %2206 }
 0x3f8   :  { %v402_v22 = vadd.f32 1.0, %v2207_v21 }
 0x3fa   :  { %2208 = vrcp.f32 %v402_v22 }
 0x404   :  { %v2209_v23 = vpop.eup %2208 }
 0x405   :  { %405 = vrot.lane.b32.xlu1 %v2209_v23, %s2295_s15  ;;  %407 = vrot.lane.b32.xlu0 %v2209_v23, %s2294_s14 }
 0x409   :  { %409 = vrot.lane.b32.xlu0 %v2209_v23, %s2293_s3 }
 0x477   :  { %v408_v24 = vpop.permute.xlu0 %407  ;;  %v406_v13 = vpop.permute.xlu1 %405 }
 0x478   :  { %v412_v25 = vmul.f32 2.0, %v408_v24  ;;  %v411_v27 = vmul.f32 %v406_v13, %v353_v61 }
 0x47a   :  { %v1554_v26 = vadd.f32 -1.0, %v412_v25 }
 0x47b   :  { %v410_v31 = vpop.permute.xlu0 %409 }
 0x47c   :  { %v414_v28 = vmul.f32 %v2209_v23, %v1554_v26 }
 0x47e   :  { %v415_v29 = vadd.f32 %v414_v28, %v411_v27 }
 0x480   :  { %2210 = vtanh.f32 %v415_v29 }
 0x48a   :  { %v2211_v30 = vpop.eup %2210 }
 0x48b   :  { %v2535_v32 = vmul.f32 %v2211_v30, %v410_v31 }
 0x48d   :  { %v419_v33 = vpack.c.bf16 %v2535_v32, %v2535_v32 }
 0x48f   :  { %1864 = vmatmul.mubr.bf16.vlgmr.msra.gmra.mrb[12].mxu0 %v419_v33 }
 0x490   :  { %1888 = vmatpush3.bf16.msra.mxu0 %v2350_v1  ;;  %1903 = vmatprep.mubr.msk.bf16.mxu0 %vm2291_vm0, %v2290_v0 }
 0x491   :  { %1889 = vmatprep.subr.bf16.mxu0 %v2290_v0 }
 0x494   :  { %1890 = vmatpush3.bf16.msra.mxu0 %v2358_v2 }
 0x495   :  { %1891 = vmatprep.subr.bf16.mxu0 %v2290_v0 }
 0x498   :  { %1892 = vmatpush3.bf16.msra.mxu0 %v2364_v3 }
 0x499   :  { %1893 = vmatprep.subr.bf16.mxu0 %v2290_v0 }
 0x49c   :  { %1894 = vmatpush3.bf16.msra.mxu0 %v2382_v7 }
 0x49d   :  { %1895 = vmatprep.subr.bf16.mxu0 %v2290_v0 }
 0x4a0   :  { %1896 = vmatpush3.bf16.msra.mxu0 %v2392_v8 }
 0x4a1   :  { %1897 = vmatprep.subr.bf16.mxu0 %v2290_v0 }
 0x4a4   :  { %1898 = vmatpush3.bf16.msra.mxu0 %v2401_v9 }
 0x4a5   :  { %1899 = vmatprep.subr.bf16.mxu0 %v2290_v0 }
 0x4a8   :  { %1900 = vmatpush3.bf16.msra.mxu0 %v2410_v10 }
 0x4a9   :  { %1901 = vmatprep.subr.bf16.mxu0 %v2290_v0 }
 0x4ac   :  { %1902 = vmatpush3.bf16.msra.mxu0 %v2419_v11 }
 0x4ad   :  { %1927 = vmatprep.subr.bf16.mxu0 %v2290_v0 }
 0x562   :  { %v454_v35 = vpop.f32.mrb[12].mxu0 }
 0x563   :  { %v460_v36 = vadd.f32 %v454_v35, %v167_v34  ;;  %v1865_v37 = vpop.f32.mrb[13].mxu0 }
 0x564   :  { %v457_v38 = vpop.f32.mrb[14].mxu0 }
 0x565   :  { %v1555_v40 = vmul.f32 -1.442695, %v460_v36  ;;  %v1866_v45 = vpop.f32.mrb[15].mxu0 }
 0x567   :  { %2212 = vpow2.f32 %v1555_v40 }
 0x571   :  { %v2213_v46 = vpop.eup %2212 }
 0x572   :  { %v464_v47 = vadd.f32 1.0, %v2213_v46  ;;  %v2171_v46 = vld [vmem:[%s2951_s4 + $0x8] sm:$0xff]  }
 0x574   :  { %2214 = vrcp.f32 %v464_v47  ;;  %v737_v47 = vpack.c.bf16 %v2508_v4, %v2474_v39  ;;  %v2174_v39 = vld [vmem:[%s2951_s4 + $0x20] sm:$0xff]   ;;  %v2175_v4 = vld [vmem:[%s2951_s4 + $0x28] sm:$0xff]  }
 0x57e   :  { %v2215_v48 = vpop.eup %2214 }
 0x57f   :  { %467 = vrot.lane.b32.xlu0 %v2215_v48, %s2295_s15  ;;  %469 = vrot.lane.b32.xlu1 %v2215_v48, %s2294_s14 }
 0x583   :  { %471 = vrot.lane.b32.xlu1 %v2215_v48, %s2293_s3 }
 0x5f1   :  { %v470_v49 = vpop.permute.xlu1 %469  ;;  %v468_v15 = vpop.permute.xlu0 %467 }
 0x5f2   :  { %v474_v50 = vmul.f32 2.0, %v470_v49  ;;  %v473_v52 = vmul.f32 %v468_v15, %v415_v29  ;;  %v2173_v49 = vld [vmem:[%s2951_s4 + $0x18] sm:$0xff]  }
 0x5f3   :  { %v2177_v15 = vld [vmem:[%s2951_s4 + $0x38] sm:$0xff]  }
 0x5f4   :  { %v1556_v51 = vadd.f32 -1.0, %v474_v50  ;;  %v2176_v50 = vld [vmem:[%s2951_s4 + $0x30] sm:$0xff]  }
 0x5f5   :  { %v472_v56 = vpop.permute.xlu1 %471 }
 0x5f6   :  { %v476_v53 = vmul.f32 %v2215_v48, %v1556_v51  ;;  %v2172_v48 = vld [vmem:[%s2951_s4 + $0x10] sm:$0xff]  }
 0x5f8   :  { %v477_v54 = vadd.f32 %v476_v53, %v473_v52  ;;  %v180_v53 = vadd.f32 %v2496_v41, %v2458_v17 }
 0x5fa   :  { %2216 = vtanh.f32 %v477_v54 }
 0x604   :  { %v2217_v55 = vpop.eup %2216 }
 0x605   :  { %v2562_v57 = vmul.f32 %v2217_v55, %v472_v56 }
 0x607   :  { %v481_v58 = vpack.c.bf16 %v2562_v57, %v2562_v57  ;;  %v738_v51 = vpack.c.bf16 %v2562_v57, %v2535_v32 }
 0x609   :  { %1884 = vmatmul.mubr.bf16.vlgmr.msra.gmra.mrb[8].mxu1 %v481_v58 }
 0x60a   :  { %1908 = vmatpush3.bf16.msra.mxu1 %v2350_v1  ;;  %1923 = vmatprep.mubr.msk.bf16.mxu1 %vm2291_vm0, %v2290_v0 }
 0x60b   :  { %1909 = vmatprep.subr.bf16.mxu1 %v2290_v0 }
 0x60e   :  { %1910 = vmatpush3.bf16.msra.mxu1 %v2358_v2 }
 0x60f   :  { %1911 = vmatprep.subr.bf16.mxu1 %v2290_v0 }
 0x612   :  { %1912 = vmatpush3.bf16.msra.mxu1 %v2364_v3 }
 0x613   :  { %1913 = vmatprep.subr.bf16.mxu1 %v2290_v0 }
 0x616   :  { %1914 = vmatpush3.bf16.msra.mxu1 %v2382_v7 }
 0x617   :  { %1915 = vmatprep.subr.bf16.mxu1 %v2290_v0 }
 0x61a   :  { %1916 = vmatpush3.bf16.msra.mxu1 %v2392_v8 }
 0x61b   :  { %1917 = vmatprep.subr.bf16.mxu1 %v2290_v0 }
 0x61e   :  { %1918 = vmatpush3.bf16.msra.mxu1 %v2401_v9 }
 0x61f   :  { %1919 = vmatprep.subr.bf16.mxu1 %v2290_v0 }
 0x622   :  { %1920 = vmatpush3.bf16.msra.mxu1 %v2410_v10 }
 0x623   :  { %1921 = vmatprep.subr.bf16.mxu1 %v2290_v0 }
 0x626   :  { %1922 = vmatpush3.bf16.msra.mxu1 %v2419_v11 }
 0x6dc   :  { %v516_v60 = vpop.f32.mrb[8].mxu1 }
 0x6dd   :  { %v522_v61 = vadd.f32 %v516_v60, %v172_v59  ;;  %v1885_v62 = vpop.f32.mrb[9].mxu1 }
 0x6de   :  { %v519_v63 = vpop.f32.mrb[10].mxu1 }
 0x6df   :  { %v1557_v5 = vmul.f32 -1.442695, %v522_v61  ;;  %v1886_v6 = vpop.f32.mrb[11].mxu1 }
 0x6e1   :  { %2218 = vpow2.f32 %v1557_v5 }
 0x6eb   :  { %v2219_v12 = vpop.eup %2218 }
 0x6ec   :  { %v526_v14 = vadd.f32 1.0, %v2219_v12 }
 0x6ee   :  { %2220 = vrcp.f32 %v526_v14 }
 0x6f8   :  { %v2221_v16 = vpop.eup %2220 }
 0x6f9   :  { %529 = vrot.lane.b32.xlu1 %v2221_v16, %s2295_s15  ;;  %531 = vrot.lane.b32.xlu0 %v2221_v16, %s2294_s14 }
 0x6fd   :  { %533 = vrot.lane.b32.xlu0 %v2221_v16, %s2293_s3 }
 0x76b   :  { %v532_v18 = vpop.permute.xlu0 %531  ;;  %v530_v42 = vpop.permute.xlu1 %529 }
 0x76c   :  { %v536_v19 = vmul.f32 2.0, %v532_v18  ;;  %v535_v21 = vmul.f32 %v530_v42, %v477_v54 }
 0x76e   :  { %v1558_v20 = vadd.f32 -1.0, %v536_v19 }
 0x76f   :  { %v534_v25 = vpop.permute.xlu0 %533 }
 0x770   :  { %v538_v22 = vmul.f32 %v2221_v16, %v1558_v20 }
 0x772   :  { %v539_v23 = vadd.f32 %v538_v22, %v535_v21 }
 0x774   :  { %2222 = vtanh.f32 %v539_v23 }
 0x77e   :  { %v2223_v24 = vpop.eup %2222 }
 0x77f   :  { %v2588_v13 = vmul.f32 %v2223_v24, %v534_v25  ;;  %v2670_v24 = vld [vmem:[%s2952_s5] sm:$0xff]   ;;  %v2675_v25 = vld [vmem:[%s2952_s5 + $0x8] sm:$0xff]  }
 0x781   :  { %v543_v26 = vpack.c.bf16 %v2588_v13, %v2588_v13 }
 0x783   :  { %1904 = vmatmul.mubr.bf16.vlgmr.msra.gmra.mrb[16].mxu0 %v543_v26 }
 0x784   :  { %1928 = vmatpush3.bf16.msra.mxu0 %v2350_v1  ;;  %1943 = vmatprep.mubr.msk.bf16.mxu0 %vm2291_vm0, %v2290_v0  ;;  %v175_v1 = vadd.f32 %v2458_v17, %v2502_v44 }
 0x785   :  { %1929 = vmatprep.subr.bf16.mxu0 %v2290_v0 }
 0x788   :  { %1930 = vmatpush3.bf16.msra.mxu0 %v2358_v2 }
 0x789   :  { %1931 = vmatprep.subr.bf16.mxu0 %v2290_v0 }
 0x78c   :  { %1932 = vmatpush3.bf16.msra.mxu0 %v2364_v3 }
 0x78d   :  { %1933 = vmatprep.subr.bf16.mxu0 %v2290_v0 }
 0x790   :  { %1934 = vmatpush3.bf16.msra.mxu0 %v2382_v7 }
 0x791   :  { %1935 = vmatprep.subr.bf16.mxu0 %v2290_v0 }
 0x794   :  { %1936 = vmatpush3.bf16.msra.mxu0 %v2392_v8 }
 0x795   :  { %1937 = vmatprep.subr.bf16.mxu0 %v2290_v0 }
 0x798   :  { %1938 = vmatpush3.bf16.msra.mxu0 %v2401_v9 }
 0x799   :  { %1939 = vmatprep.subr.bf16.mxu0 %v2290_v0 }
 0x79c   :  { %1940 = vmatpush3.bf16.msra.mxu0 %v2410_v10 }
 0x79d   :  { %1941 = vmatprep.subr.bf16.mxu0 %v2290_v0 }
 0x7a0   :  { %1942 = vmatpush3.bf16.msra.mxu0 %v2419_v11  ;;  %v2170_v11 = vld [vmem:[%s2951_s4] sm:$0xff]  }
 0x7a1   :  { %1971 = vmatprep.subr.bf16.mxu0 %v2290_v0  ;;  %1947 = vmatprep.subr.bf16.mxu1 %v2170_v11 }
 0x856   :  { %v578_v2 = vpop.f32.mrb[16].mxu0 }
 0x857   :  { %v584_v3 = vadd.f32 %v578_v2, %v175_v1  ;;  %v1905_v7 = vpop.f32.mrb[17].mxu0 }
 0x858   :  { %v581_v8 = vpop.f32.mrb[18].mxu0 }
 0x859   :  { %v1559_v27 = vmul.f32 -1.442695, %v584_v3  ;;  %v1906_v28 = vpop.f32.mrb[19].mxu0 }
 0x85a   :  { %v2690_v28 = vld [vmem:[%s2952_s5 + $0x10] sm:$0xff]  }
 0x85b   :  { %2224 = vpow2.f32 %v1559_v27 }
 0x865   :  { %v2225_v9 = vpop.eup %2224 }
 0x866   :  { %v588_v29 = vadd.f32 1.0, %v2225_v9 }
 0x868   :  { %2226 = vrcp.f32 %v588_v29  ;;  %v2717_v29 = vld [vmem:[%s2952_s5 + $0x28] sm:$0xff]  }
 0x872   :  { %v2227_v10 = vpop.eup %2226 }
 0x873   :  { %591 = vrot.lane.b32.xlu0 %v2227_v10, %s2295_s15  ;;  %593 = vrot.lane.b32.xlu1 %v2227_v10, %s2294_s14 }
 0x877   :  { %595 = vrot.lane.b32.xlu1 %v2227_v10, %s2293_s3 }
 0x8e5   :  { %v594_v44 = vpop.permute.xlu1 %593  ;;  %v592_v31 = vpop.permute.xlu0 %591 }
 0x8e6   :  { %v598_v30 = vmul.f32 2.0, %v594_v44  ;;  %v597_v34 = vmul.f32 %v592_v31, %v539_v23  ;;  %v2737_v44 = vld [vmem:[%s2952_s5 + $0x38] sm:$0xff]  }
 0x8e8   :  { %v1560_v33 = vadd.f32 -1.0, %v598_v30 }
 0x8e9   :  { %v596_v38 = vpop.permute.xlu1 %595 }
 0x8ea   :  { %v600_v35 = vmul.f32 %v2227_v10, %v1560_v33 }
 0x8ec   :  { %v601_v36 = vadd.f32 %v600_v35, %v597_v34 }
 0x8ee   :  { %2228 = vtanh.f32 %v601_v36 }
 0x8f8   :  { %v2229_v37 = vpop.eup %2228 }
 0x8f9   :  { %v603_v40 = vmul.f32 %v2229_v37, %v596_v38 }
 0x8fb   :  { %v605_v45 = vpack.c.bf16 %v603_v40, %v603_v40  ;;  %v739_v52 = vpack.c.bf16 %v603_v40, %v2588_v13  ;;  %v183_v13 = vadd.f32 %v2500_v43, %v2458_v17  ;;  %v2699_v17 = vld [vmem:[%s2952_s5 + $0x18] sm:$0xff]   ;;  %v2708_v43 = vld [vmem:[%s2952_s5 + $0x20] sm:$0xff]  }
 0x8fd   :  { %1924 = vmatmul.mubr.bf16.vlgmr.msra.gmra.mrb[12].mxu1 %v605_v45 }
 0x8fe   :  { %1948 = vmatpush3.bf16.msra.mxu1 %v2170_v11  ;;  %1963 = vmatprep.mubr.bf16.mxu1 %v737_v47  ;;  %v2727_v11 = vld [vmem:[%s2952_s5 + $0x30] sm:$0xff]  }
 0x8ff   :  { %1949 = vmatprep.subr.bf16.mxu1 %v2171_v46 }
 0x902   :  { %1950 = vmatpush3.bf16.msra.mxu1 %v2171_v46 }
 0x903   :  { %1951 = vmatprep.subr.bf16.mxu1 %v2172_v48 }
 0x906   :  { %1952 = vmatpush3.bf16.msra.mxu1 %v2172_v48  ;;  %v2769_v48 = vld [vmem:[%s2953_s6] ss:$0 sm:$0xff] }
 0x907   :  { %1953 = vmatprep.subr.bf16.mxu1 %v2173_v49 }
 0x90a   :  { %1954 = vmatpush3.bf16.msra.mxu1 %v2173_v49 }
 0x90b   :  { %1955 = vmatprep.subr.bf16.mxu1 %v2174_v39 }
 0x90e   :  { %1956 = vmatpush3.bf16.msra.mxu1 %v2174_v39 }
 0x90f   :  { %1957 = vmatprep.subr.bf16.mxu1 %v2175_v4 }
 0x912   :  { %1958 = vmatpush3.bf16.msra.mxu1 %v2175_v4 }
 0x913   :  { %1959 = vmatprep.subr.bf16.mxu1 %v2176_v50 }
 0x916   :  { %1960 = vmatpush3.bf16.msra.mxu1 %v2176_v50 }
 0x917   :  { %1961 = vmatprep.subr.bf16.mxu1 %v2177_v15 }
 0x91a   :  { %1962 = vmatpush3.bf16.msra.mxu1 %v2177_v15 }
 0x91b   :  { %1991 = vmatprep.subr.bf16.mxu1 %v2290_v0 }
 0x91d   :  { %1964 = vmatmul.mubr.bf16.vlgmr.msra.gmra.mrb[16].mxu1 %v738_v51 }
 0x91e   :  { %1967 = vmatprep.mubr.bf16.mxu1 %v739_v52  ;;  %1992 = vmatpush3.bf16.msra.mxu1 %v2670_v24 }
 0x91f   :  { %1993 = vmatprep.subr.bf16.mxu1 %v2290_v0 }
 0x922   :  { %1994 = vmatpush3.bf16.msra.mxu1 %v2675_v25 }
 0x923   :  { %1995 = vmatprep.subr.bf16.mxu1 %v2290_v0 }
 0x926   :  { %1996 = vmatpush3.bf16.msra.mxu1 %v2690_v28 }
 0x927   :  { %1997 = vmatprep.subr.bf16.mxu1 %v2290_v0 }
 0x92a   :  { %1998 = vmatpush3.bf16.msra.mxu1 %v2699_v17 }
 0x92b   :  { %1999 = vmatprep.subr.bf16.mxu1 %v2290_v0 }
 0x92e   :  { %2000 = vmatpush3.bf16.msra.mxu1 %v2708_v43 }
 0x92f   :  { %2001 = vmatprep.subr.bf16.mxu1 %v2290_v0 }
 0x932   :  { %2002 = vmatpush3.bf16.msra.mxu1 %v2717_v29 }
 0x933   :  { %2003 = vmatprep.subr.bf16.mxu1 %v2290_v0 }
 0x936   :  { %2004 = vmatpush3.bf16.msra.mxu1 %v2727_v11 }
 0x937   :  { %2005 = vmatprep.subr.bf16.mxu1 %v2290_v0 }
 0x93a   :  { %2006 = vmatpush3.bf16.msra.mxu1 %v2737_v44 }
 0x93b   :  { %2031 = vmatprep.subr.bf16.mxu1 %v2290_v0 }
 0x9d0   :  { %v640_v54 = vpop.f32.mrb[12].mxu1 }
 0x9d1   :  { %v646_v55 = vadd.f32 %v640_v54, %v180_v53  ;;  %v1925_v56 = vpop.f32.mrb[13].mxu1 }
 0x9d2   :  { %v643_v58 = vpop.f32.mrb[14].mxu1 }
 0x9d3   :  { %v1561_v59 = vmul.f32 -1.442695, %v646_v55  ;;  %v1926_v60 = vpop.f32.mrb[15].mxu1 }
 0x9d5   :  { %2230 = vpow2.f32 %v1561_v59 }
 0x9df   :  { %v2231_v61 = vpop.eup %2230 }
 0x9e0   :  { %v650_v62 = vadd.f32 1.0, %v2231_v61 }
 0x9e2   :  { %2232 = vrcp.f32 %v650_v62 }
 0x9ec   :  { %v2233_v32 = vpop.eup %2232 }
 0x9ed   :  { %653 = vrot.lane.b32.xlu1 %v2233_v32, %s2295_s15  ;;  %655 = vrot.lane.b32.xlu0 %v2233_v32, %s2294_s14 }
 0x9f0   :  { %v2649_v57 = vpop.f32.mrb[16].mxu1 }
 0x9f1   :  { %v2651_v63 = vpop.f32.mrb[17].mxu1  ;;  %657 = vrot.lane.b32.xlu0 %v2233_v32, %s2293_s3 }
 0x9f2   :  { %v2654_v41 = vpop.f32.mrb[18].mxu1  ;;  %v847_v49 = vadd.f32 %v2769_v48, %v2651_v63 }
 0x9f3   :  { %v2656_v5 = vpop.f32.mrb[19].mxu1 }
 0xa5f   :  { %v656_v6 = vpop.permute.xlu0 %655  ;;  %v654_v14 = vpop.permute.xlu1 %653 }
 0xa60   :  { %v660_v12 = vmul.f32 2.0, %v656_v6  ;;  %v659_v18 = vmul.f32 %v654_v14, %v601_v36 }
 0xa62   :  { %v1562_v16 = vadd.f32 -1.0, %v660_v12 }
 0xa63   :  { %v658_v21 = vpop.permute.xlu0 %657 }
 0xa64   :  { %v662_v19 = vmul.f32 %v2233_v32, %v1562_v16 }
 0xa66   :  { %v2658_v42 = vadd.f32 %v662_v19, %v659_v18 }
 0xa68   :  { %2234 = vtanh.f32 %v2658_v42 }
 0xa72   :  { %v2235_v20 = vpop.eup %2234 }
 0xa73   :  { %v2661_v22 = vmul.f32 %v2235_v20, %v658_v21  ;;  %v850_v20 = vadd.f32 %v2769_v48, %v2656_v5 }
 0xa75   :  { %v667_v23 = vpack.c.bf16 %v2661_v22, %v2661_v22 }
 0xa77   :  { %1944 = vmatmul.mubr.bf16.vlgmr.msra.gmra.mrb[20].mxu0 %v667_v23 }
 0xa78   :  { %1987 = vmatprep.mubr.msk.bf16.mxu0 %vm2291_vm0, %v2290_v0  ;;  %1972 = vmatpush3.bf16.msra.mxu0 %v2670_v24 }
 0xa79   :  { %1973 = vmatprep.subr.bf16.mxu0 %v2290_v0 }
 0xa7c   :  { %1974 = vmatpush3.bf16.msra.mxu0 %v2675_v25 }
 0xa7d   :  { %1975 = vmatprep.subr.bf16.mxu0 %v2290_v0 }
 0xa80   :  { %1976 = vmatpush3.bf16.msra.mxu0 %v2690_v28 }
 0xa81   :  { %1977 = vmatprep.subr.bf16.mxu0 %v2290_v0 }
 0xa84   :  { %1978 = vmatpush3.bf16.msra.mxu0 %v2699_v17 }
 0xa85   :  { %1979 = vmatprep.subr.bf16.mxu0 %v2290_v0 }
 0xa88   :  { %1980 = vmatpush3.bf16.msra.mxu0 %v2708_v43 }
 0xa89   :  { %1981 = vmatprep.subr.bf16.mxu0 %v2290_v0 }
 0xa8c   :  { %1982 = vmatpush3.bf16.msra.mxu0 %v2717_v29 }
 0xa8d   :  { %1983 = vmatprep.subr.bf16.mxu0 %v2290_v0 }
 0xa90   :  { %1984 = vmatpush3.bf16.msra.mxu0 %v2727_v11 }
 0xa91   :  { %1985 = vmatprep.subr.bf16.mxu0 %v2290_v0 }
 0xa94   :  { %1986 = vmatpush3.bf16.msra.mxu0 %v2737_v44 }
 0xa95   :  { %2011 = vmatprep.subr.bf16.mxu0 %v2290_v0 }
 0xb4a   :  { %v702_v26 = vpop.f32.mrb[20].mxu0 }
 0xb4b   :  { %v708_v1 = vadd.f32 %v702_v26, %v183_v13  ;;  %v1945_v2 = vpop.f32.mrb[21].mxu0 }
 0xb4c   :  { %v705_v3 = vpop.f32.mrb[22].mxu0 }
 0xb4d   :  { %v1563_v7 = vmul.f32 -1.442695, %v708_v1  ;;  %v1946_v8 = vpop.f32.mrb[23].mxu0 }
 0xb4f   :  { %2236 = vpow2.f32 %v1563_v7 }
 0xb59   :  { %v2237_v27 = vpop.eup %2236 }
 0xb5a   :  { %v712_v9 = vadd.f32 1.0, %v2237_v27 }
 0xb5c   :  { %2238 = vrcp.f32 %v712_v9 }
 0xb66   :  { %v2239_v10 = vpop.eup %2238 }
 0xb67   :  { %715 = vrot.lane.b32.xlu0 %v2239_v10, %s2295_s15  ;;  %717 = vrot.lane.b32.xlu1 %v2239_v10, %s2294_s14 }
 0xb6b   :  { %719 = vrot.lane.b32.xlu1 %v2239_v10, %s2293_s3 }
 0xbd9   :  { %v718_v30 = vpop.permute.xlu1 %717  ;;  %v716_v33 = vpop.permute.xlu0 %715 }
 0xbda   :  { %v722_v31 = vmul.f32 2.0, %v718_v30  ;;  %v721_v35 = vmul.f32 %v716_v33, %v2658_v42 }
 0xbdc   :  { %v1564_v34 = vadd.f32 -1.0, %v722_v31 }
 0xbdd   :  { %v720_v40 = vpop.permute.xlu1 %719 }
 0xbde   :  { %v724_v36 = vmul.f32 %v2239_v10, %v1564_v34 }
 0xbe0   :  { %v725_v37 = vadd.f32 %v724_v36, %v721_v35 }
 0xbe2   :  { %2240 = vtanh.f32 %v725_v37 }
 0xbec   :  { %v2241_v38 = vpop.eup %2240 }
 0xbed   :  { %v727_v45 = vmul.f32 %v2241_v38, %v720_v40 }
 0xbef   :  { %v740_v46 = vpack.c.bf16 %v727_v45, %v2661_v22  ;;  %v877_v47 = vpack.c.bf16 %v727_v45, %v727_v45 }
 0xbf1   :  { %1968 = vmatmul.mubr.bf16.gmra.mrb[20].mxu1 %v740_v46  ;;  %1988 = vmatmul.mubr.bf16.vlgmr.msra.gmra.mrb[24].mxu0 %v877_v47 }
 0xbf2   :  { %2007 = vmatprep.mubr.msk.bf16.mxu1 %vm2291_vm0, %v2290_v0  ;;  %2012 = vmatpush3.bf16.msra.mxu0 %v2670_v24 }
 0xbf3   :  { %2013 = vmatprep.subr.bf16.mxu0 %v2290_v0  ;;  %2027 = vmatprep.mubr.msk.bf16.mxu0 %vm2291_vm0, %v2290_v0 }
 0xbf6   :  { %2014 = vmatpush3.bf16.msra.mxu0 %v2675_v25 }
 0xbf7   :  { %2015 = vmatprep.subr.bf16.mxu0 %v2290_v0 }
 0xbfa   :  { %2016 = vmatpush3.bf16.msra.mxu0 %v2690_v28 }
 0xbfb   :  { %2017 = vmatprep.subr.bf16.mxu0 %v2290_v0 }
 0xbfe   :  { %2018 = vmatpush3.bf16.msra.mxu0 %v2699_v17 }
 0xbff   :  { %2019 = vmatprep.subr.bf16.mxu0 %v2290_v0 }
 0xc02   :  { %2020 = vmatpush3.bf16.msra.mxu0 %v2708_v43 }
 0xc03   :  { %2021 = vmatprep.subr.bf16.mxu0 %v2290_v0 }
 0xc06   :  { %2022 = vmatpush3.bf16.msra.mxu0 %v2717_v29 }
 0xc07   :  { %2023 = vmatprep.subr.bf16.mxu0 %v2290_v0 }
 0xc0a   :  { %2024 = vmatpush3.bf16.msra.mxu0 %v2727_v11 }
 0xc0b   :  { %2025 = vmatprep.subr.bf16.mxu0 %v2290_v0 }
 0xc0e   :  { %2026 = vmatpush3.bf16.msra.mxu0 %v2737_v44 }
 0xc0f   :  { %2051 = vmatprep.subr.bf16.mxu0 %v2290_v0 }
 0xcc4   :  { %v2773_v39 = vpop.f32.mrb[20].mxu1  ;;  %v960_v4 = vpop.f32.mrb[24].mxu0 }
 0xcc5   :  { %v966_v50 = vadd.f32 %v960_v4, %v847_v49  ;;  %v2775_v15 = vpop.f32.mrb[21].mxu1  ;;  %v1989_v51 = vpop.f32.mrb[25].mxu0 }
 0xcc6   :  { %v2777_v52 = vpop.f32.mrb[22].mxu1  ;;  %v963_v53 = vpop.f32.mrb[26].mxu0 }
 0xcc7   :  { %v1582_v54 = vmul.f32 -1.442695, %v966_v50  ;;  %v2779_v55 = vpop.f32.mrb[23].mxu1  ;;  %v1990_v56 = vpop.f32.mrb[27].mxu0 }
 0xcc9   :  { %2242 = vpow2.f32 %v1582_v54 }
 0xcd3   :  { %v2243_v58 = vpop.eup %2242 }
 0xcd4   :  { %v970_v59 = vadd.f32 1.0, %v2243_v58 }
 0xcd6   :  { %2244 = vrcp.f32 %v970_v59 }
 0xce0   :  { %v2245_v60 = vpop.eup %2244 }
 0xce1   :  { %973 = vrot.lane.b32.xlu1 %v2245_v60, %s2295_s15  ;;  %975 = vrot.lane.b32.xlu0 %v2245_v60, %s2294_s14 }
 0xce5   :  { %977 = vrot.lane.b32.xlu0 %v2245_v60, %s2293_s3 }
 0xd53   :  { %v976_v61 = vpop.permute.xlu0 %975  ;;  %v974_v32 = vpop.permute.xlu1 %973 }
 0xd54   :  { %v980_v62 = vmul.f32 2.0, %v976_v61  ;;  %v979_v6 = vmul.f32 %v974_v32, %v725_v37  ;;  %v855_v37 = vadd.f32 %v2649_v57, %v2769_v48 }
 0xd56   :  { %v1583_v63 = vadd.f32 -1.0, %v980_v62 }
 0xd57   :  { %v978_v18 = vpop.permute.xlu0 %977 }
 0xd58   :  { %v982_v12 = vmul.f32 %v2245_v60, %v1583_v63 }
 0xd5a   :  { %v983_v14 = vadd.f32 %v982_v12, %v979_v6  ;;  %v858_v6 = vadd.f32 %v2654_v41, %v2769_v48 }
 0xd5c   :  { %2246 = vtanh.f32 %v983_v14 }
 0xd66   :  { %v2247_v16 = vpop.eup %2246 }
 0xd67   :  { %v985_v19 = vmul.f32 %v2247_v16, %v978_v18 }
 0xd69   :  { %v986_v42 = vpack.c.bf16 %v985_v19, %v985_v19 }
 0xd6b   :  { %2008 = vmatmul.mubr.bf16.vlgmr.msra.gmra.mrb[24].mxu1 %v986_v42 }
 0xd6c   :  { %2032 = vmatpush3.bf16.msra.mxu1 %v2670_v24  ;;  %2047 = vmatprep.mubr.msk.bf16.mxu1 %vm2291_vm0, %v2290_v0 }
 0xd6d   :  { %2033 = vmatprep.subr.bf16.mxu1 %v2290_v0 }
 0xd70   :  { %2034 = vmatpush3.bf16.msra.mxu1 %v2675_v25 }
 0xd71   :  { %2035 = vmatprep.subr.bf16.mxu1 %v2290_v0 }
 0xd74   :  { %2036 = vmatpush3.bf16.msra.mxu1 %v2690_v28 }
 0xd75   :  { %2037 = vmatprep.subr.bf16.mxu1 %v2290_v0 }
 0xd78   :  { %2038 = vmatpush3.bf16.msra.mxu1 %v2699_v17 }
 0xd79   :  { %2039 = vmatprep.subr.bf16.mxu1 %v2290_v0 }
 0xd7c   :  { %2040 = vmatpush3.bf16.msra.mxu1 %v2708_v43 }
 0xd7d   :  { %2041 = vmatprep.subr.bf16.mxu1 %v2290_v0 }
 0xd80   :  { %2042 = vmatpush3.bf16.msra.mxu1 %v2717_v29 }
 0xd81   :  { %2043 = vmatprep.subr.bf16.mxu1 %v2290_v0 }
 0xd84   :  { %2044 = vmatpush3.bf16.msra.mxu1 %v2727_v11 }
 0xd85   :  { %2045 = vmatprep.subr.bf16.mxu1 %v2290_v0 }
 0xd88   :  { %2046 = vmatpush3.bf16.msra.mxu1 %v2737_v44 }
 0xd89   :  { %2071 = vmatprep.subr.bf16.mxu1 %v2290_v0 }
 0xe3e   :  { %v1021_v21 = vpop.f32.mrb[24].mxu1 }
 0xe3f   :  { %v1027_v22 = vadd.f32 %v1021_v21, %v850_v20  ;;  %v2009_v23 = vpop.f32.mrb[25].mxu1 }
 0xe40   :  { %v1024_v13 = vpop.f32.mrb[26].mxu1 }
 0xe41   :  { %v1584_v26 = vmul.f32 -1.442695, %v1027_v22  ;;  %v2010_v1 = vpop.f32.mrb[27].mxu1 }
 0xe43   :  { %2248 = vpow2.f32 %v1584_v26 }
 0xe4d   :  { %v2249_v2 = vpop.eup %2248 }
 0xe4e   :  { %v1031_v3 = vadd.f32 1.0, %v2249_v2 }
 0xe50   :  { %2250 = vrcp.f32 %v1031_v3 }
 0xe5a   :  { %v2251_v7 = vpop.eup %2250 }
 0xe5b   :  { %1034 = vrot.lane.b32.xlu0 %v2251_v7, %s2295_s15  ;;  %1036 = vrot.lane.b32.xlu1 %v2251_v7, %s2294_s14 }
 0xe5f   :  { %1038 = vrot.lane.b32.xlu1 %v2251_v7, %s2293_s3 }
 0xecd   :  { %v1037_v8 = vpop.permute.xlu1 %1036  ;;  %v1035_v5 = vpop.permute.xlu0 %1034 }
 0xece   :  { %v1041_v27 = vmul.f32 2.0, %v1037_v8  ;;  %v1040_v10 = vmul.f32 %v1035_v5, %v983_v14 }
 0xed0   :  { %v1585_v9 = vadd.f32 -1.0, %v1041_v27 }
 0xed1   :  { %v1039_v34 = vpop.permute.xlu1 %1038 }
 0xed2   :  { %v1043_v30 = vmul.f32 %v2251_v7, %v1585_v9  ;;  %v863_v9 = vadd.f32 %v2769_v48, %v2775_v15 }
 0xed4   :  { %v1044_v31 = vadd.f32 %v1043_v30, %v1040_v10 }
 0xed6   :  { %2252 = vtanh.f32 %v1044_v31 }
 0xee0   :  { %v2253_v33 = vpop.eup %2252 }
 0xee1   :  { %v1046_v35 = vmul.f32 %v2253_v33, %v1039_v34 }
 0xee3   :  { %v1047_v36 = vpack.c.bf16 %v1046_v35, %v1046_v35 }
 0xee5   :  { %2028 = vmatmul.mubr.bf16.vlgmr.msra.gmra.mrb[28].mxu0 %v1047_v36 }
 0xee6   :  { %2052 = vmatpush3.bf16.msra.mxu0 %v2670_v24  ;;  %2067 = vmatprep.mubr.msk.bf16.mxu0 %vm2291_vm0, %v2290_v0 }
 0xee7   :  { %2053 = vmatprep.subr.bf16.mxu0 %v2290_v0 }
 0xeea   :  { %2054 = vmatpush3.bf16.msra.mxu0 %v2675_v25 }
 0xeeb   :  { %2055 = vmatprep.subr.bf16.mxu0 %v2290_v0 }
 0xeee   :  { %2056 = vmatpush3.bf16.msra.mxu0 %v2690_v28 }
 0xeef   :  { %2057 = vmatprep.subr.bf16.mxu0 %v2290_v0 }
 0xef2   :  { %2058 = vmatpush3.bf16.msra.mxu0 %v2699_v17 }
 0xef3   :  { %2059 = vmatprep.subr.bf16.mxu0 %v2290_v0 }
 0xef6   :  { %2060 = vmatpush3.bf16.msra.mxu0 %v2708_v43 }
 0xef7   :  { %2061 = vmatprep.subr.bf16.mxu0 %v2290_v0 }
 0xefa   :  { %2062 = vmatpush3.bf16.msra.mxu0 %v2717_v29 }
 0xefb   :  { %2063 = vmatprep.subr.bf16.mxu0 %v2290_v0 }
 0xefe   :  { %2064 = vmatpush3.bf16.msra.mxu0 %v2727_v11 }
 0xeff   :  { %2065 = vmatprep.subr.bf16.mxu0 %v2290_v0 }
 0xf02   :  { %2066 = vmatpush3.bf16.msra.mxu0 %v2737_v44 }
 0xf03   :  { %2091 = vmatprep.subr.bf16.mxu0 %v2290_v0 }
 0xfb8   :  { %v1082_v38 = vpop.f32.mrb[28].mxu0 }
 0xfb9   :  { %v1088_v40 = vadd.f32 %v1082_v38, %v855_v37  ;;  %v2029_v45 = vpop.f32.mrb[29].mxu0 }
 0xfba   :  { %v1085_v46 = vpop.f32.mrb[30].mxu0 }
 0xfbb   :  { %v1586_v47 = vmul.f32 -1.442695, %v1088_v40  ;;  %v2030_v49 = vpop.f32.mrb[31].mxu0 }
 0xfbd   :  { %2254 = vpow2.f32 %v1586_v47 }
 0xfc7   :  { %v2255_v4 = vpop.eup %2254 }
 0xfc8   :  { %v1092_v50 = vadd.f32 1.0, %v2255_v4 }
 0xfca   :  { %2256 = vrcp.f32 %v1092_v50 }
 0xfd4   :  { %v2257_v51 = vpop.eup %2256 }
 0xfd5   :  { %1095 = vrot.lane.b32.xlu1 %v2257_v51, %s2295_s15  ;;  %1097 = vrot.lane.b32.xlu0 %v2257_v51, %s2294_s14 }
 0xfd9   :  { %1099 = vrot.lane.b32.xlu0 %v2257_v51, %s2293_s3 }
0x1047   :  { %v1098_v53 = vpop.permute.xlu0 %1097  ;;  %v1096_v57 = vpop.permute.xlu1 %1095 }
0x1048   :  { %v1102_v54 = vmul.f32 2.0, %v1098_v53  ;;  %v1101_v58 = vmul.f32 %v1096_v57, %v1044_v31 }
0x104a   :  { %v1587_v56 = vadd.f32 -1.0, %v1102_v54 }
0x104b   :  { %v1100_v62 = vpop.permute.xlu0 %1099 }
0x104c   :  { %v1104_v59 = vmul.f32 %v2257_v51, %v1587_v56 }
0x104e   :  { %v1105_v60 = vadd.f32 %v1104_v59, %v1101_v58 }
0x1050   :  { %2258 = vtanh.f32 %v1105_v60 }
0x105a   :  { %v2259_v61 = vpop.eup %2258 }
0x105b   :  { %v1107_v32 = vmul.f32 %v2259_v61, %v1100_v62 }
0x105d   :  { %v1108_v63 = vpack.c.bf16 %v1107_v32, %v1107_v32 }
0x105f   :  { %2048 = vmatmul.mubr.bf16.vlgmr.msra.gmra.mrb[28].mxu1 %v1108_v63 }
0x1060   :  { %2072 = vmatpush3.bf16.msra.mxu1 %v2670_v24  ;;  %2087 = vmatprep.mubr.msk.bf16.mxu1 %vm2291_vm0, %v2290_v0 }
0x1061   :  { %2073 = vmatprep.subr.bf16.mxu1 %v2290_v0 }
0x1064   :  { %2074 = vmatpush3.bf16.msra.mxu1 %v2675_v25 }
0x1065   :  { %2075 = vmatprep.subr.bf16.mxu1 %v2290_v0 }
0x1068   :  { %2076 = vmatpush3.bf16.msra.mxu1 %v2690_v28 }
0x1069   :  { %2077 = vmatprep.subr.bf16.mxu1 %v2290_v0 }
0x106c   :  { %2078 = vmatpush3.bf16.msra.mxu1 %v2699_v17 }
0x106d   :  { %2079 = vmatprep.subr.bf16.mxu1 %v2290_v0 }
0x1070   :  { %2080 = vmatpush3.bf16.msra.mxu1 %v2708_v43 }
0x1071   :  { %2081 = vmatprep.subr.bf16.mxu1 %v2290_v0 }
0x1074   :  { %2082 = vmatpush3.bf16.msra.mxu1 %v2717_v29 }
0x1075   :  { %2083 = vmatprep.subr.bf16.mxu1 %v2290_v0 }
0x1078   :  { %2084 = vmatpush3.bf16.msra.mxu1 %v2727_v11 }
0x1079   :  { %2085 = vmatprep.subr.bf16.mxu1 %v2290_v0 }
0x107c   :  { %2086 = vmatpush3.bf16.msra.mxu1 %v2737_v44 }
0x107d   :  { %2111 = vmatprep.subr.bf16.mxu1 %v2290_v0 }
0x1132   :  { %v1143_v12 = vpop.f32.mrb[28].mxu1 }
0x1133   :  { %v1149_v14 = vadd.f32 %v1143_v12, %v858_v6  ;;  %v2049_v16 = vpop.f32.mrb[29].mxu1 }
0x1134   :  { %v1146_v18 = vpop.f32.mrb[30].mxu1  ;;  %v871_v16 = vadd.f32 %v2773_v39, %v2769_v48 }
0x1135   :  { %v1588_v19 = vmul.f32 -1.442695, %v1149_v14  ;;  %v2050_v42 = vpop.f32.mrb[31].mxu1 }
0x1137   :  { %2260 = vpow2.f32 %v1588_v19 }
0x1141   :  { %v2261_v20 = vpop.eup %2260 }
0x1142   :  { %v1153_v21 = vadd.f32 1.0, %v2261_v20 }
0x1144   :  { %2262 = vrcp.f32 %v1153_v21 }
0x114e   :  { %v2263_v22 = vpop.eup %2262 }
0x114f   :  { %1156 = vrot.lane.b32.xlu0 %v2263_v22, %s2295_s15  ;;  %1158 = vrot.lane.b32.xlu1 %v2263_v22, %s2294_s14 }
0x1153   :  { %1160 = vrot.lane.b32.xlu1 %v2263_v22, %s2293_s3 }
0x11c1   :  { %v1159_v23 = vpop.permute.xlu1 %1158  ;;  %v1157_v41 = vpop.permute.xlu0 %1156 }
0x11c2   :  { %v1163_v13 = vmul.f32 2.0, %v1159_v23  ;;  %v1162_v1 = vmul.f32 %v1157_v41, %v1105_v60 }
0x11c4   :  { %v1589_v26 = vadd.f32 -1.0, %v1163_v13 }
0x11c5   :  { %v1161_v8 = vpop.permute.xlu1 %1160 }
0x11c6   :  { %v1165_v2 = vmul.f32 %v2263_v22, %v1589_v26 }
0x11c8   :  { %v1166_v3 = vadd.f32 %v1165_v2, %v1162_v1 }
0x11ca   :  { %2264 = vtanh.f32 %v1166_v3 }
0x11d4   :  { %v2265_v7 = vpop.eup %2264 }
0x11d5   :  { %v1168_v27 = vmul.f32 %v2265_v7, %v1161_v8 }
0x11d7   :  { %v1169_v5 = vpack.c.bf16 %v1168_v27, %v1168_v27 }
0x11d9   :  { %2068 = vmatmul.mubr.bf16.vlgmr.msra.gmra.mrb[32].mxu0 %v1169_v5 }
0x11da   :  { %2092 = vmatpush3.bf16.msra.mxu0 %v2670_v24  ;;  %2107 = vmatprep.mubr.msk.bf16.mxu0 %vm2291_vm0, %v2290_v0 }
0x11db   :  { %2093 = vmatprep.subr.bf16.mxu0 %v2290_v0 }
0x11de   :  { %2094 = vmatpush3.bf16.msra.mxu0 %v2675_v25 }
0x11df   :  { %2095 = vmatprep.subr.bf16.mxu0 %v2290_v0 }
0x11e2   :  { %2096 = vmatpush3.bf16.msra.mxu0 %v2690_v28 }
0x11e3   :  { %2097 = vmatprep.subr.bf16.mxu0 %v2290_v0 }
0x11e6   :  { %2098 = vmatpush3.bf16.msra.mxu0 %v2699_v17 }
0x11e7   :  { %2099 = vmatprep.subr.bf16.mxu0 %v2290_v0 }
0x11ea   :  { %2100 = vmatpush3.bf16.msra.mxu0 %v2708_v43 }
0x11eb   :  { %2101 = vmatprep.subr.bf16.mxu0 %v2290_v0 }
0x11ee   :  { %2102 = vmatpush3.bf16.msra.mxu0 %v2717_v29 }
0x11ef   :  { %2103 = vmatprep.subr.bf16.mxu0 %v2290_v0 }
0x11f2   :  { %2104 = vmatpush3.bf16.msra.mxu0 %v2727_v11 }
0x11f3   :  { %2105 = vmatprep.subr.bf16.mxu0 %v2290_v0 }
0x11f6   :  { %2106 = vmatpush3.bf16.msra.mxu0 %v2737_v44 }
0x11f7   :  { %2131 = vmatprep.subr.bf16.mxu0 %v2290_v0 }
0x12ac   :  { %v1204_v10 = vpop.f32.mrb[32].mxu0 }
0x12ad   :  { %v1210_v30 = vadd.f32 %v1204_v10, %v863_v9  ;;  %v2069_v31 = vpop.f32.mrb[33].mxu0 }
0x12ae   :  { %v1207_v33 = vpop.f32.mrb[34].mxu0  ;;  %v2187_v31 = vld [vmem:[%s2954_s7 + $0x8] sm:$0xff]  }
0x12af   :  { %v1590_v34 = vmul.f32 -1.442695, %v1210_v30  ;;  %v2070_v35 = vpop.f32.mrb[35].mxu0  ;;  %v2186_v30 = vld [vmem:[%s2954_s7] sm:$0xff]   ;;  %v874_v33 = vadd.f32 %v2777_v52, %v2769_v48 }
0x12b0   :  { %v2190_v52 = vld [vmem:[%s2954_s7 + $0x20] sm:$0xff]  }
0x12b1   :  { %2266 = vpow2.f32 %v1590_v34 }
0x12bb   :  { %v2267_v36 = vpop.eup %2266 }
0x12bc   :  { %v1214_v37 = vadd.f32 1.0, %v2267_v36 }
0x12be   :  { %2268 = vrcp.f32 %v1214_v37 }
0x12c8   :  { %v2269_v38 = vpop.eup %2268 }
0x12c9   :  { %1217 = vrot.lane.b32.xlu1 %v2269_v38, %s2295_s15  ;;  %1219 = vrot.lane.b32.xlu0 %v2269_v38, %s2294_s14 }
0x12cd   :  { %1221 = vrot.lane.b32.xlu0 %v2269_v38, %s2293_s3 }
0x133b   :  { %v1220_v40 = vpop.permute.xlu0 %1219  ;;  %v1218_v15 = vpop.permute.xlu1 %1217 }
0x133c   :  { %v1224_v45 = vmul.f32 2.0, %v1220_v40  ;;  %v1223_v47 = vmul.f32 %v1218_v15, %v1166_v3  ;;  %v2188_v15 = vld [vmem:[%s2954_s7 + $0x10] sm:$0xff]  }
0x133e   :  { %v1591_v46 = vadd.f32 -1.0, %v1224_v45 }
0x133f   :  { %v1222_v51 = vpop.permute.xlu0 %1221 }
0x1340   :  { %v1226_v49 = vmul.f32 %v2269_v38, %v1591_v46 }
0x1342   :  { %v1227_v4 = vadd.f32 %v1226_v49, %v1223_v47  ;;  %v2191_v47 = vld [vmem:[%s2954_s7 + $0x28] sm:$0xff]  }
0x1344   :  { %2270 = vtanh.f32 %v1227_v4 }
0x134e   :  { %v2271_v50 = vpop.eup %2270 }
0x134f   :  { %v1229_v53 = vmul.f32 %v2271_v50, %v1222_v51  ;;  %v2193_v50 = vld [vmem:[%s2954_s7 + $0x38] sm:$0xff]  }
0x1351   :  { %v1230_v54 = vpack.c.bf16 %v1229_v53, %v1229_v53 }
0x1353   :  { %2088 = vmatmul.mubr.bf16.vlgmr.msra.gmra.mrb[32].mxu1 %v1230_v54 }
0x1354   :  { %2112 = vmatpush3.bf16.msra.mxu1 %v2670_v24  ;;  %2127 = vmatprep.mubr.msk.bf16.mxu1 %vm2291_vm0, %v2290_v0  ;;  %v866_v24 = vadd.f32 %v2769_v48, %v2779_v55  ;;  %v2189_v48 = vld [vmem:[%s2954_s7 + $0x18] sm:$0xff]  }
0x1355   :  { %2113 = vmatprep.subr.bf16.mxu1 %v2290_v0 }
0x1358   :  { %2114 = vmatpush3.bf16.msra.mxu1 %v2675_v25 }
0x1359   :  { %2115 = vmatprep.subr.bf16.mxu1 %v2290_v0 }
0x135c   :  { %2116 = vmatpush3.bf16.msra.mxu1 %v2690_v28 }
0x135d   :  { %2117 = vmatprep.subr.bf16.mxu1 %v2290_v0 }
0x1360   :  { %2118 = vmatpush3.bf16.msra.mxu1 %v2699_v17 }
0x1361   :  { %2119 = vmatprep.subr.bf16.mxu1 %v2290_v0 }
0x1364   :  { %2120 = vmatpush3.bf16.msra.mxu1 %v2708_v43 }
0x1365   :  { %2121 = vmatprep.subr.bf16.mxu1 %v2290_v0 }
0x1368   :  { %2122 = vmatpush3.bf16.msra.mxu1 %v2717_v29 }
0x1369   :  { %2123 = vmatprep.subr.bf16.mxu1 %v2290_v0 }
0x136c   :  { %2124 = vmatpush3.bf16.msra.mxu1 %v2727_v11 }
0x136d   :  { %2125 = vmatprep.subr.bf16.mxu1 %v2290_v0 }
0x1370   :  { %2126 = vmatpush3.bf16.msra.mxu1 %v2737_v44 }
0x1426   :  { %v1265_v25 = vpop.f32.mrb[32].mxu1 }
0x1427   :  { %v1271_v28 = vadd.f32 %v1265_v25, %v866_v24  ;;  %v2089_v17 = vpop.f32.mrb[33].mxu1 }
0x1428   :  { %v1268_v57 = vpop.f32.mrb[34].mxu1 }
0x1429   :  { %v1592_v43 = vmul.f32 -1.442695, %v1271_v28  ;;  %v2090_v56 = vpop.f32.mrb[35].mxu1 }
0x142b   :  { %2272 = vpow2.f32 %v1592_v43 }
0x1435   :  { %v2273_v58 = vpop.eup %2272 }
0x1436   :  { %v1275_v29 = vadd.f32 1.0, %v2273_v58 }
0x1438   :  { %2274 = vrcp.f32 %v1275_v29 }
0x1442   :  { %v2275_v59 = vpop.eup %2274 }
0x1443   :  { %1278 = vrot.lane.b32.xlu0 %v2275_v59, %s2295_s15  ;;  %1280 = vrot.lane.b32.xlu1 %v2275_v59, %s2294_s14 }
0x1447   :  { %1282 = vrot.lane.b32.xlu1 %v2275_v59, %s2293_s3 }
0x14b5   :  { %v1281_v11 = vpop.permute.xlu1 %1280  ;;  %v1279_v55 = vpop.permute.xlu0 %1278 }
0x14b6   :  { %v1285_v44 = vmul.f32 2.0, %v1281_v11  ;;  %v1284_v61 = vmul.f32 %v1279_v55, %v1227_v4  ;;  %v2192_v4 = vld [vmem:[%s2954_s7 + $0x30] sm:$0xff]  }
0x14b8   :  { %v1593_v60 = vadd.f32 -1.0, %v1285_v44 }
0x14b9   :  { %v1283_v6 = vpop.permute.xlu1 %1282 }
0x14ba   :  { %v1287_v62 = vmul.f32 %v2275_v59, %v1593_v60 }
0x14bc   :  { %v1288_v32 = vadd.f32 %v1287_v62, %v1284_v61 }
0x14be   :  { %2276 = vtanh.f32 %v1288_v32 }
0x14c8   :  { %v2277_v63 = vpop.eup %2276 }
0x14c9   :  { %v1290_v12 = vmul.f32 %v2277_v63, %v1283_v6 }
0x14cb   :  { %v1291_v14 = vpack.c.bf16 %v1290_v12, %v1290_v12 }
0x14cd   :  { %2108 = vmatmul.mubr.bf16.vlgmr.msra.gmra.mrb[36].mxu0 %v1291_v14 }
0x14ce   :  { %2147 = vmatprep.mubr.msk.bf16.mxu0 %vm2291_vm0, %v2290_v0  ;;  %2132 = vmatpush3.bf16.msra.mxu0 %v2186_v30 }
0x14cf   :  { %2133 = vmatprep.subr.bf16.mxu0 %v2290_v0 }
0x14d2   :  { %2134 = vmatpush3.bf16.msra.mxu0 %v2187_v31 }
0x14d3   :  { %2135 = vmatprep.subr.bf16.mxu0 %v2290_v0 }
0x14d6   :  { %2136 = vmatpush3.bf16.msra.mxu0 %v2188_v15 }
0x14d7   :  { %2137 = vmatprep.subr.bf16.mxu0 %v2290_v0 }
0x14da   :  { %2138 = vmatpush3.bf16.msra.mxu0 %v2189_v48 }
0x14db   :  { %2139 = vmatprep.subr.bf16.mxu0 %v2290_v0 }
0x14de   :  { %2140 = vmatpush3.bf16.msra.mxu0 %v2190_v52 }
0x14df   :  { %2141 = vmatprep.subr.bf16.mxu0 %v2290_v0 }
0x14e2   :  { %2142 = vmatpush3.bf16.msra.mxu0 %v2191_v47 }
0x14e3   :  { %2143 = vmatprep.subr.bf16.mxu0 %v2290_v0 }
0x14e6   :  { %2144 = vmatpush3.bf16.msra.mxu0 %v2192_v4 }
0x14e7   :  { %2145 = vmatprep.subr.bf16.mxu0 %v2290_v0  ;;  %v1598_v0 = vld [vmem:[%s2955_s8] ss:$0 sm:$0xff] }
0x14ea   :  { %2146 = vmatpush3.bf16.msra.mxu0 %v2193_v50 }
0x15a0   :  { %v1326_v18 = vpop.f32.mrb[36].mxu0 }
0x15a1   :  { %v1332_v19 = vadd.f32 %v1326_v18, %v871_v16  ;;  %v2109_v42 = vpop.f32.mrb[37].mxu0 }
0x15a2   :  { %v1329_v20 = vpop.f32.mrb[38].mxu0 }
0x15a3   :  { %v1594_v21 = vmul.f32 -1.442695, %v1332_v19  ;;  %v2110_v22 = vpop.f32.mrb[39].mxu0 }
0x15a5   :  { %2278 = vpow2.f32 %v1594_v21 }
0x15af   :  { %v2279_v23 = vpop.eup %2278 }
0x15b0   :  { %v1336_v13 = vadd.f32 1.0, %v2279_v23 }
0x15b2   :  { %2280 = vrcp.f32 %v1336_v13 }
0x15bc   :  { %v2281_v41 = vpop.eup %2280 }
0x15bd   :  { %1339 = vrot.lane.b32.xlu1 %v2281_v41, %s2295_s15  ;;  %1341 = vrot.lane.b32.xlu0 %v2281_v41, %s2294_s14 }
0x15c1   :  { %1343 = vrot.lane.b32.xlu0 %v2281_v41, %s2293_s3 }
0x162f   :  { %v1342_v26 = vpop.permute.xlu0 %1341  ;;  %v1340_v39 = vpop.permute.xlu1 %1339 }
0x1630   :  { %v1346_v1 = vmul.f32 2.0, %v1342_v26  ;;  %v1345_v3 = vmul.f32 %v1340_v39, %v1288_v32 }
0x1632   :  { %v1595_v2 = vadd.f32 -1.0, %v1346_v1 }
0x1633   :  { %v1344_v5 = vpop.permute.xlu0 %1343 }
0x1634   :  { %v1348_v7 = vmul.f32 %v2281_v41, %v1595_v2 }
0x1636   :  { %v1349_v8 = vadd.f32 %v1348_v7, %v1345_v3 }
0x1638   :  { %2282 = vtanh.f32 %v1349_v8 }
0x1642   :  { %v2283_v27 = vpop.eup %2282 }
0x1643   :  { %v1351_v9 = vmul.f32 %v2283_v27, %v1344_v5 }
0x1645   :  { %v1352_v10 = vpack.c.bf16 %v1351_v9, %v1351_v9 }
0x1647   :  { %2128 = vmatmul.mubr.bf16.vlgmr.msra.gmra.mrb[36].mxu1 %v1352_v10 }
0x171a   :  { %v1387_v34 = vpop.f32.mrb[36].mxu1 }
0x171b   :  { %v1393_v35 = vadd.f32 %v1387_v34, %v874_v33  ;;  %v2129_v36 = vpop.f32.mrb[37].mxu1 }
0x171c   :  { %v1390_v37 = vpop.f32.mrb[38].mxu1 }
0x171d   :  { %v1596_v38 = vmul.f32 -1.442695, %v1393_v35  ;;  %v2130_v40 = vpop.f32.mrb[39].mxu1 }
0x171f   :  { %2284 = vpow2.f32 %v1596_v38 }
0x1729   :  { %v2285_v45 = vpop.eup %2284 }
0x172a   :  { %v1397_v46 = vadd.f32 1.0, %v2285_v45 }
0x172c   :  { %2286 = vrcp.f32 %v1397_v46 }
0x1736   :  { %v2287_v49 = vpop.eup %2286 }
0x1737   :  { %1400 = vrot.lane.b32.xlu0 %v2287_v49, %s2295_s15  ;;  %1402 = vrot.lane.b32.xlu1 %v2287_v49, %s2294_s14 }
0x173b   :  { %1404 = vrot.lane.b32.xlu1 %v2287_v49, %s2293_s3 }
0x17a9   :  { %v1403_v51 = vpop.permute.xlu1 %1402  ;;  %v1401_v54 = vpop.permute.xlu0 %1400 }
0x17aa   :  { %v1407_v53 = vmul.f32 2.0, %v1403_v51  ;;  %v1406_v25 = vmul.f32 %v1401_v54, %v1349_v8 }
0x17ac   :  { %v1597_v24 = vadd.f32 -1.0, %v1407_v53 }
0x17ad   :  { %v1405_v43 = vpop.permute.xlu1 %1404 }
0x17ae   :  { %v1409_v28 = vmul.f32 %v2287_v49, %v1597_v24 }
0x17b0   :  { %v1410_v17 = vadd.f32 %v1409_v28, %v1406_v25 }
0x17b2   :  { %2288 = vtanh.f32 %v1410_v17 }
0x17bc   :  { %v2289_v57 = vpop.eup %2288 }
0x17bd   :  { %v1412_v56 = vmul.f32 %v2289_v57, %v1405_v43 }
0x17bf   :  { %v1413_v58 = vpack.c.bf16 %v1412_v56, %v1412_v56 }
0x17c1   :  { %2148 = vmatmul.mubr.bf16.vlgmr.msra.gmra.mrb[40].mxu0 %v1413_v58 }
0x1894   :  { %v1519_v29 = vpop.f32.mrb[40].mxu0 }
0x1895   :  { %v1520_v59 = vadd.f32 %v1598_v0, %v1519_v29  ;;  %v2149_v11 = vpop.f32.mrb[41].mxu0 }
0x1896   :  { %v1522_v44 = vpop.f32.mrb[42].mxu0 }
0x1897   :  { %1526 = vst.msk [vmem:[%s2956_s9] sm:$0xff] %vm1525_vm2, %v1520_v59  ;;  %v2150_v55 = vpop.f32.mrb[43].mxu0 }

</bundles_post_ra>
